<compile_context>
chip_gen: v7x
topology: tpu7x:2x2x1
jax: 0.10.0
libtpu: 0.0.40
codegen_flags: <defaults>
</compile_context>

<pallas_src>
import functools
import math

import jax
import jax.numpy as jnp
from jax.experimental import pallas as pl
from jax.experimental.pallas import tpu as pltpu


def encoder_kernel(x_ref,
                   wqkv_ref, bqkv_ref,
                   wo_ref, bo_ref,
                   g1_ref, be1_ref,
                   w1_ref, bf1_ref,
                   w2_ref, bf2_ref,
                   g2_ref, be2_ref,
                   o_ref, act_ref, *, heads):
    """One (batch-tile, layer) grid step of the Encoder.

    Grid = (batch_tiles, depth): batch axis is "parallel" (megacore), depth
    axis is "arbitrary".  Per-layer weights arrive as (1, ...) blocks that the
    pipeliner double-buffers (layer l+1 weights DMA while layer l computes).
    The current batch tile's activation is carried across layers in an f32
    VMEM scratch (act_ref); the output is written only on the last layer.
    """
    layer = pl.program_id(1)
    B, S, K = act_ref.shape            # B == batch tile size
    H = heads
    d = K // H
    N = B * S
    scale = 1.0 / math.sqrt(d)
    f32 = jnp.float32
    cdt = jnp.bfloat16                 # MXU operand dtype

    @pl.when(layer == 0)
    def _init():
        act_ref[...] = x_ref[...].astype(f32)

    x = act_ref[...].reshape(N, K)                       # (N, K) f32 residual

    wqkv = wqkv_ref[0]                                   # (K, 3K) bf16
    bqkv = bqkv_ref[0]                                   # (1, 3K) f32
    wo = wo_ref[0]                                       # (K, K)  bf16
    bo = bo_ref[0]                                       # (1, K)  f32
    g1, be1 = g1_ref[0], be1_ref[0]                      # (1, K)  f32
    w1 = w1_ref[0]                                       # (K, hidden) bf16
    bf1 = bf1_ref[0]                                     # (1, hidden) f32
    w2 = w2_ref[0]                                       # (hidden, K) bf16
    bf2 = bf2_ref[0]                                     # (1, K) f32
    g2, be2 = g2_ref[0], be2_ref[0]

    # ---- fused QKV projection: one MXU op instead of three ------------------
    qkv = jnp.dot(x.astype(cdt), wqkv, preferred_element_type=f32) + bqkv
    # Cast once per layer (keeps f32<->bf16 convert volume low, esp. on v5e).
    q = (qkv[:, :K] * scale).reshape(B, S, K).astype(cdt)   # 1/sqrt(d) folded in
    k = qkv[:, K:2 * K].reshape(B, S, K).astype(cdt)
    v = qkv[:, 2 * K:].reshape(B, S, K).astype(cdt)

    # ---- multi-head self attention (q = k = v = x) ---------------------------
    # Heads are a static loop of 3-D (single leading batch dim) einsums, which
    # Mosaic's dot_general lowering supports; per-head contexts are assembled
    # along the lane axis and the output projection is a single full-K matmul.
    # TODO(synk): KV tiling + online softmax for large S (full (B,S,S) scores
    #             are materialized here); pad K to >=128 lanes for real models.
    ctx_heads = []
    for h in range(H):
        sl = slice(h * d, (h + 1) * d)
        s = jnp.einsum('bqd,bkd->bqk', q[:, :, sl], k[:, :, sl],
                       preferred_element_type=f32)       # (B, S, S) f32
        s = s - jnp.max(s, axis=-1, keepdims=True)
        p = jnp.exp(s)
        p = p * pl.reciprocal(jnp.sum(p, axis=-1, keepdims=True), approx=True)
        ctx_heads.append(
            jnp.einsum('bqk,bkd->bqd', p.astype(cdt), v[:, :, sl],
                       preferred_element_type=f32))      # (B, S, d) f32
    ctx = jnp.concatenate(ctx_heads, axis=-1).reshape(N, K)
    attended = jnp.dot(ctx.astype(cdt), wo, preferred_element_type=f32) + bo

    # TODO(synk): dropout1/dropout2/ff-dropout are identity (eval mode); the
    #             get_weights attention-weight return path is not implemented.

    # ---- residual + LayerNorm 1 (f32) ----------------------------------------
    y = attended + x
    mu = jnp.mean(y, axis=-1, keepdims=True)
    var = jnp.mean((y - mu) ** 2, axis=-1, keepdims=True)
    y = (y - mu) * jax.lax.rsqrt(var + 1e-5) * g1 + be1

    # ---- feed-forward: Linear -> GELU (exact erf, PyTorch parity) -> Linear ---
    h1 = jnp.dot(y.astype(cdt), w1, preferred_element_type=f32) + bf1
    h1 = 0.5 * h1 * (1.0 + jax.lax.erf(h1 * (2.0 ** -0.5)))
    h2 = jnp.dot(h1.astype(cdt), w2, preferred_element_type=f32) + bf2

    # ---- residual + LayerNorm 2 (f32) ----------------------------------------
    z = h2 + y
    mu2 = jnp.mean(z, axis=-1, keepdims=True)
    var2 = jnp.mean((z - mu2) ** 2, axis=-1, keepdims=True)
    x_new = (z - mu2) * jax.lax.rsqrt(var2 + 1e-5) * g2 + be2

    act_ref[...] = x_new.reshape(B, S, K)

    @pl.when(layer == pl.num_programs(1) - 1)
    def _store():
        o_ref[...] = x_new.reshape(B, S, K).astype(o_ref.dtype)


def encoder_forward(x, packed, heads, depth, b_tile=1):
    """Apply the whole Encoder via a (batch_tiles, depth) pipelined grid."""
    B, S, K = x.shape
    hidden = packed["w1"].shape[-1]
    assert B % b_tile == 0

    names = ["wqkv", "bqkv", "wo", "bo", "g1", "be1",
             "w1", "bf1", "w2", "bf2", "g2", "be2"]
    args = [x] + [packed[n] for n in names]

    def w_spec(arr):
        # One layer's slice per grid step; last two dims are full extents.
        return pl.BlockSpec((1,) + tuple(arr.shape[1:]), lambda b, l: (l, 0, 0))

    act_spec = pl.BlockSpec((b_tile, S, K), lambda b, l: (b, 0, 0))
    in_specs = [act_spec] + [w_spec(packed[n]) for n in names]
    out_specs = pl.BlockSpec((b_tile, S, K), lambda b, l: (b, 0, 0))

    # --- advisory cost estimate for XLA's scheduler ---------------------------
    N = B * S
    d = K // heads
    flops_per_layer = (2 * N * K * 3 * K                 # fused QKV proj
                       + 4 * B * heads * S * S * d       # scores + ctx
                       + 2 * N * K * K                   # output proj
                       + 2 * N * K * hidden              # FFN up
                       + 2 * N * hidden * K)             # FFN down
    bytes_accessed = sum(int(a.size) * a.dtype.itemsize for a in args)
    bytes_accessed += int(x.size) * x.dtype.itemsize     # output
    cost = pl.CostEstimate(
        flops=int(depth * flops_per_layer),
        transcendentals=int(depth * (B * heads * S * S + N * hidden)),
        bytes_accessed=int(bytes_accessed))

    # --- explicit VMEM budget: 2x one layer's weights (double buffering) ------
    layer_weight_bytes = sum(
        math.prod(packed[n].shape[1:]) * packed[n].dtype.itemsize
        for n in names)
    act_block_bytes = b_tile * S * K * 4
    work_bytes = (b_tile * S * (3 * K + hidden + 4 * K) * 4   # qkv/ffn temps
                  + 2 * b_tile * S * S * 4)                   # scores + probs
    vmem_needed = (2 * layer_weight_bytes      # double-buffered layer weights
                   + 4 * act_block_bytes       # x in + out (double-buffered)
                   + act_block_bytes           # activation carry scratch
                   + work_bytes)
    vmem_limit = int(min(max(2 * vmem_needed, 32 * 1024 * 1024),
                         64 * 1024 * 1024))    # fits v5e/v6e/v7x scoped VMEM

    kernel = functools.partial(encoder_kernel, heads=heads)
    return pl.pallas_call(
        kernel,
        out_shape=jax.ShapeDtypeStruct((B, S, K), x.dtype),
        grid_spec=pltpu.PrefetchScalarGridSpec(
            num_scalar_prefetch=0,
            grid=(B // b_tile, depth),         # (parallel batch, arbitrary depth)
            in_specs=in_specs,
            out_specs=out_specs,
            scratch_shapes=[pltpu.VMEM((b_tile, S, K), jnp.float32)]),
        compiler_params=pltpu.CompilerParams(
            dimension_semantics=("parallel", "arbitrary"),
            vmem_limit_bytes=vmem_limit),
        cost_estimate=cost,
    )(*args)


def init_encoder_params(key, depth, K, hidden):
    """Deterministic synthetic weights in PyTorch layout (y = x @ W.T + b)."""
    f32 = jnp.float32
    s = 0.05
    layers = []
    for lk in jax.random.split(key, depth):
        ks = jax.random.split(lk, 8)
        layers.append({
            "in_proj_w": jax.random.normal(ks[0], (3 * K, K), f32) * s,
            "in_proj_b": jax.random.normal(ks[1], (3 * K,), f32) * s,
            "out_w": jax.random.normal(ks[2], (K, K), f32) * s,
            "out_b": jax.random.normal(ks[3], (K,), f32) * s,
            "w1": jax.random.normal(ks[4], (hidden, K), f32) * s,
            "b1": jax.random.normal(ks[5], (hidden,), f32) * s,
            "w2": jax.random.normal(ks[6], (K, hidden), f32) * s,
            "b2": jax.random.normal(ks[7], (K,), f32) * s,
            "g1": jnp.ones((K,), f32), "be1": jnp.zeros((K,), f32),
            "g2": jnp.ones((K,), f32), "be2": jnp.zeros((K,), f32),
        })
    return layers


def pack_params(layers):
    """Stack per-layer params along a leading layer axis, pre-transpose weights
    to (in, out) layout, and cast MXU weights to bf16 (biases/LN stay f32)."""
    bf16 = jnp.bfloat16

    def stack(fn):
        return jnp.stack([fn(p) for p in layers], axis=0)

    return {
        "wqkv": stack(lambda p: p["in_proj_w"].T).astype(bf16),   # (L, K, 3K)
        "bqkv": stack(lambda p: p["in_proj_b"][None, :]),         # (L, 1, 3K)
        "wo":   stack(lambda p: p["out_w"].T).astype(bf16),       # (L, K, K)
        "bo":   stack(lambda p: p["out_b"][None, :]),             # (L, 1, K)
        "g1":   stack(lambda p: p["g1"][None, :]),
        "be1":  stack(lambda p: p["be1"][None, :]),
        "w1":   stack(lambda p: p["w1"].T).astype(bf16),          # (L, K, hidden)
        "bf1":  stack(lambda p: p["b1"][None, :]),                # (L, 1, hidden)
        "w2":   stack(lambda p: p["w2"].T).astype(bf16),          # (L, hidden, K)
        "bf2":  stack(lambda p: p["b2"][None, :]),
        "g2":   stack(lambda p: p["g2"][None, :]),
        "be2":  stack(lambda p: p["be2"][None, :]),
    }


def encoder_reference(x, packed, heads, depth):
    """Pure-JAX f32 reference (uses the same bf16-quantized weights)."""
    f32 = jnp.float32
    B, S, K = x.shape
    d = K // heads
    N = B * S
    x = x.astype(f32).reshape(N, K)
    for l in range(depth):
        wqkv = packed["wqkv"][l].astype(f32)
        bqkv = packed["bqkv"][l]
        wo = packed["wo"][l].astype(f32)
        bo = packed["bo"][l]
        g1, be1 = packed["g1"][l], packed["be1"][l]
        w1 = packed["w1"][l].astype(f32)
        bf1 = packed["bf1"][l]
        w2 = packed["w2"][l].astype(f32)
        bf2 = packed["bf2"][l]
        g2, be2 = packed["g2"][l], packed["be2"][l]

        qkv = x @ wqkv + bqkv
        q = qkv[:, :K].reshape(B, S, heads, d).transpose(0, 2, 1, 3)
        k = qkv[:, K:2 * K].reshape(B, S, heads, d).transpose(0, 2, 1, 3)
        v = qkv[:, 2 * K:].reshape(B, S, heads, d).transpose(0, 2, 1, 3)
        s = jnp.einsum('bhqd,bhkd->bhqk', q, k) / math.sqrt(d)
        p = jax.nn.softmax(s, axis=-1)
        ctx = jnp.einsum('bhqk,bhkd->bhqd', p, v)
        ctx = ctx.transpose(0, 2, 1, 3).reshape(N, K)
        attended = ctx @ wo + bo

        y = attended + x
        y = ((y - y.mean(-1, keepdims=True))
             * jax.lax.rsqrt(y.var(-1, keepdims=True) + 1e-5) * g1 + be1)
        h1 = y @ w1 + bf1
        h1 = 0.5 * h1 * (1.0 + jax.lax.erf(h1 * (2.0 ** -0.5)))
        h2 = h1 @ w2 + bf2
        z = h2 + y
        x = ((z - z.mean(-1, keepdims=True))
             * jax.lax.rsqrt(z.var(-1, keepdims=True) + 1e-5) * g2 + be2)
    return x.reshape(B, S, K)


if __name__ == "__main__":
    # Encoder(depth, dimension, heads, hidden_dim, dropout) hyperparameters.
    depth = 2
    dimension = 32      # k (embedding dim)
    heads = 4
    hidden_dim = 64
    batch = 2
    seq = 8

    root = jax.random.PRNGKey(0)
    kx, kp = jax.random.split(root)
    x = jax.random.normal(kx, (batch, seq, dimension), jnp.float32)

    layers = init_encoder_params(kp, depth, dimension, hidden_dim)
    packed = pack_params(layers)

    out = encoder_forward(x, packed, heads, depth)
    out = jax.block_until_ready(out)
    assert out.shape == (batch, seq, dimension)
    assert bool(jnp.all(jnp.isfinite(out)))

    ref = encoder_reference(x, packed, heads, depth)
    max_err = float(jnp.max(jnp.abs(out - ref)))
    assert max_err < 1e-1, f"max abs error vs reference: {max_err}"

    print("KERNEL_OK")
</pallas_src>

<mosaic_0001>
module attributes {stable_mosaic.version = 11 : i64} {
  func.func @encoder_kernel(%arg0: i32, %arg1: i32, %arg2: memref<1x8x32xf32, #tpu.memory_space<vmem>>, %arg3: memref<1x32x96xbf16, #tpu.memory_space<vmem>>, %arg4: memref<1x1x96xf32, #tpu.memory_space<vmem>>, %arg5: memref<1x32x32xbf16, #tpu.memory_space<vmem>>, %arg6: memref<1x1x32xf32, #tpu.memory_space<vmem>>, %arg7: memref<1x1x32xf32, #tpu.memory_space<vmem>>, %arg8: memref<1x1x32xf32, #tpu.memory_space<vmem>>, %arg9: memref<1x32x64xbf16, #tpu.memory_space<vmem>>, %arg10: memref<1x1x64xf32, #tpu.memory_space<vmem>>, %arg11: memref<1x64x32xbf16, #tpu.memory_space<vmem>>, %arg12: memref<1x1x32xf32, #tpu.memory_space<vmem>>, %arg13: memref<1x1x32xf32, #tpu.memory_space<vmem>>, %arg14: memref<1x1x32xf32, #tpu.memory_space<vmem>>, %arg15: memref<1x8x32xf32, #tpu.memory_space<vmem>>, %arg16: memref<1x8x32xf32, #tpu.memory_space<vmem>>) attributes {dimension_semantics = [#tpu.dimension_semantics<parallel>, #tpu.dimension_semantics<arbitrary>], iteration_bounds = array<i64: 2, 2>, scalar_prefetch = 0 : i64, scratch_operands = 1 : i64, tpu.core_type = #tpu.core_type<tc>, window_params = [{transform_indices = @transform_0, window_bounds = array<i64: 1, 8, 32>}, {transform_indices = @transform_1, window_bounds = array<i64: 1, 32, 96>}, {transform_indices = @transform_2, window_bounds = array<i64: 1, 1, 96>}, {transform_indices = @transform_3, window_bounds = array<i64: 1, 32, 32>}, {transform_indices = @transform_4, window_bounds = array<i64: 1, 1, 32>}, {transform_indices = @transform_5, window_bounds = array<i64: 1, 1, 32>}, {transform_indices = @transform_6, window_bounds = array<i64: 1, 1, 32>}, {transform_indices = @transform_7, window_bounds = array<i64: 1, 32, 64>}, {transform_indices = @transform_8, window_bounds = array<i64: 1, 1, 64>}, {transform_indices = @transform_9, window_bounds = array<i64: 1, 64, 32>}, {transform_indices = @transform_10, window_bounds = array<i64: 1, 1, 32>}, {transform_indices = @transform_11, window_bounds = array<i64: 1, 1, 32>}, {transform_indices = @transform_12, window_bounds = array<i64: 1, 1, 32>}, {transform_indices = @transform_13, window_bounds = array<i64: 1, 8, 32>}]} {
    %c0_i32 = arith.constant 0 : i32
    %0 = arith.cmpi eq, %arg1, %c0_i32 : i32
    %1 = arith.extui %0 : i1 to i32
    %c0_i32_0 = arith.constant 0 : i32
    %2 = arith.cmpi ne, %1, %c0_i32_0 : i32
    scf.if %2 {
      %c0_76 = arith.constant 0 : index
      %c0_77 = arith.constant 0 : index
      %c0_78 = arith.constant 0 : index
      %181 = vector.load %arg2[%c0_76, %c0_77, %c0_78] : memref<1x8x32xf32, #tpu.memory_space<vmem>>, vector<1x8x32xf32>
      %c0_79 = arith.constant 0 : index
      %c0_80 = arith.constant 0 : index
      %c0_81 = arith.constant 0 : index
      %182 = vector.load %arg16[%c0_79, %c0_80, %c0_81] : memref<1x8x32xf32, #tpu.memory_space<vmem>>, vector<1x8x32xf32>
      tpu.vector_store %arg16[%c0_79, %c0_80, %c0_81], %181 {strides = array<i32>} : memref<1x8x32xf32, #tpu.memory_space<vmem>>, vector<1x8x32xf32>,
    } else {
    }
    %c0 = arith.constant 0 : index
    %c0_1 = arith.constant 0 : index
    %c0_2 = arith.constant 0 : index
    %3 = vector.load %arg16[%c0, %c0_1, %c0_2] : memref<1x8x32xf32, #tpu.memory_space<vmem>>, vector<1x8x32xf32>
    %4 = vector.shape_cast %3 : vector<1x8x32xf32> to vector<8x32xf32>
    %c0_3 = arith.constant 0 : index
    %c0_4 = arith.constant 0 : index
    %c0_5 = arith.constant 0 : index
    %5 = vector.load %arg3[%c0_3, %c0_4, %c0_5] : memref<1x32x96xbf16, #tpu.memory_space<vmem>>, vector<1x32x96xbf16>
    %6 = vector.shape_cast %5 : vector<1x32x96xbf16> to vector<32x96xbf16>
    %c0_6 = arith.constant 0 : index
    %c0_7 = arith.constant 0 : index
    %c0_8 = arith.constant 0 : index
    %7 = vector.load %arg4[%c0_6, %c0_7, %c0_8] : memref<1x1x96xf32, #tpu.memory_space<vmem>>, vector<1x1x96xf32>
    %8 = vector.shape_cast %7 : vector<1x1x96xf32> to vector<1x96xf32>
    %c0_9 = arith.constant 0 : index
    %c0_10 = arith.constant 0 : index
    %c0_11 = arith.constant 0 : index
    %9 = vector.load %arg5[%c0_9, %c0_10, %c0_11] : memref<1x32x32xbf16, #tpu.memory_space<vmem>>, vector<1x32x32xbf16>
    %10 = vector.shape_cast %9 : vector<1x32x32xbf16> to vector<32x32xbf16>
    %c0_12 = arith.constant 0 : index
    %c0_13 = arith.constant 0 : index
    %c0_14 = arith.constant 0 : index
    %11 = vector.load %arg6[%c0_12, %c0_13, %c0_14] : memref<1x1x32xf32, #tpu.memory_space<vmem>>, vector<1x1x32xf32>
    %12 = vector.shape_cast %11 : vector<1x1x32xf32> to vector<1x32xf32>
    %c0_15 = arith.constant 0 : index
    %c0_16 = arith.constant 0 : index
    %c0_17 = arith.constant 0 : index
    %13 = vector.load %arg7[%c0_15, %c0_16, %c0_17] : memref<1x1x32xf32, #tpu.memory_space<vmem>>, vector<1x1x32xf32>
    %14 = vector.shape_cast %13 : vector<1x1x32xf32> to vector<1x32xf32>
    %c0_18 = arith.constant 0 : index
    %c0_19 = arith.constant 0 : index
    %c0_20 = arith.constant 0 : index
    %15 = vector.load %arg8[%c0_18, %c0_19, %c0_20] : memref<1x1x32xf32, #tpu.memory_space<vmem>>, vector<1x1x32xf32>
    %16 = vector.shape_cast %15 : vector<1x1x32xf32> to vector<1x32xf32>
    %c0_21 = arith.constant 0 : index
    %c0_22 = arith.constant 0 : index
    %c0_23 = arith.constant 0 : index
    %17 = vector.load %arg9[%c0_21, %c0_22, %c0_23] : memref<1x32x64xbf16, #tpu.memory_space<vmem>>, vector<1x32x64xbf16>
    %18 = vector.shape_cast %17 : vector<1x32x64xbf16> to vector<32x64xbf16>
    %c0_24 = arith.constant 0 : index
    %c0_25 = arith.constant 0 : index
    %c0_26 = arith.constant 0 : index
    %19 = vector.load %arg10[%c0_24, %c0_25, %c0_26] : memref<1x1x64xf32, #tpu.memory_space<vmem>>, vector<1x1x64xf32>
    %20 = vector.shape_cast %19 : vector<1x1x64xf32> to vector<1x64xf32>
    %c0_27 = arith.constant 0 : index
    %c0_28 = arith.constant 0 : index
    %c0_29 = arith.constant 0 : index
    %21 = vector.load %arg11[%c0_27, %c0_28, %c0_29] : memref<1x64x32xbf16, #tpu.memory_space<vmem>>, vector<1x64x32xbf16>
    %22 = vector.shape_cast %21 : vector<1x64x32xbf16> to vector<64x32xbf16>
    %c0_30 = arith.constant 0 : index
    %c0_31 = arith.constant 0 : index
    %c0_32 = arith.constant 0 : index
    %23 = vector.load %arg12[%c0_30, %c0_31, %c0_32] : memref<1x1x32xf32, #tpu.memory_space<vmem>>, vector<1x1x32xf32>
    %24 = vector.shape_cast %23 : vector<1x1x32xf32> to vector<1x32xf32>
    %c0_33 = arith.constant 0 : index
    %c0_34 = arith.constant 0 : index
    %c0_35 = arith.constant 0 : index
    %25 = vector.load %arg13[%c0_33, %c0_34, %c0_35] : memref<1x1x32xf32, #tpu.memory_space<vmem>>, vector<1x1x32xf32>
    %26 = vector.shape_cast %25 : vector<1x1x32xf32> to vector<1x32xf32>
    %c0_36 = arith.constant 0 : index
    %c0_37 = arith.constant 0 : index
    %c0_38 = arith.constant 0 : index
    %27 = vector.load %arg14[%c0_36, %c0_37, %c0_38] : memref<1x1x32xf32, #tpu.memory_space<vmem>>, vector<1x1x32xf32>
    %28 = vector.shape_cast %27 : vector<1x1x32xf32> to vector<1x32xf32>
    %29 = arith.truncf %4 : vector<8x32xf32> to vector<8x32xbf16>
    %cst = arith.constant dense<0.000000e+00> : vector<8x96xf32>
    %30 = tpu.matmul %29, %6, %cst {dimension_numbers = #tpu.dot_dimension_numbers<[1], [0], [0], [1], [0, 0, 1, 1], [], []>} : vector<8x32xbf16>, vector<32x96xbf16>, vector<8x96xf32> -> vector<8x96xf32>
    %31 = vector.broadcast %8 : vector<1x96xf32> to vector<8x96xf32>
    %32 = arith.addf %30, %31 : vector<8x96xf32>
    %33 = vector.extract_strided_slice %32 {offsets = [0, 0], sizes = [8, 32], strides = [1, 1]} : vector<8x96xf32> to vector<8x32xf32>
    %cst_39 = arith.constant 0.353553385 : f32
    %34 = vector.broadcast %cst_39 : f32 to vector<8x32xf32>
    %35 = arith.mulf %33, %34 : vector<8x32xf32>
    %36 = vector.shape_cast %35 : vector<8x32xf32> to vector<1x8x32xf32>
    %37 = arith.truncf %36 : vector<1x8x32xf32> to vector<1x8x32xbf16>
    %38 = vector.extract_strided_slice %32 {offsets = [0, 32], sizes = [8, 32], strides = [1, 1]} : vector<8x96xf32> to vector<8x32xf32>
    %39 = vector.shape_cast %38 : vector<8x32xf32> to vector<1x8x32xf32>
    %40 = arith.truncf %39 : vector<1x8x32xf32> to vector<1x8x32xbf16>
    %41 = vector.extract_strided_slice %32 {offsets = [0, 64], sizes = [8, 32], strides = [1, 1]} : vector<8x96xf32> to vector<8x32xf32>
    %42 = vector.shape_cast %41 : vector<8x32xf32> to vector<1x8x32xf32>
    %43 = arith.truncf %42 : vector<1x8x32xf32> to vector<1x8x32xbf16>
    %44 = vector.extract_strided_slice %37 {offsets = [0, 0, 0], sizes = [1, 8, 8], strides = [1, 1, 1]} : vector<1x8x32xbf16> to vector<1x8x8xbf16>
    %45 = vector.extract_strided_slice %40 {offsets = [0, 0, 0], sizes = [1, 8, 8], strides = [1, 1, 1]} : vector<1x8x32xbf16> to vector<1x8x8xbf16>
    "tpu.trace_start"() <{level = 10 : i32, message = "bqd,bkd->bqk"}> : () -> ()
    %cst_40 = arith.constant dense<0.000000e+00> : vector<1x8x8xf32>
    %46 = tpu.matmul %44, %45, %cst_40 {dimension_numbers = #tpu.dot_dimension_numbers<[2], [2], [1], [1], [0, 0, 0, 1, 1, 1], [0], [0]>} : vector<1x8x8xbf16>, vector<1x8x8xbf16>, vector<1x8x8xf32> -> vector<1x8x8xf32>
    "tpu.trace_stop"() : () -> ()
    %cst_41 = arith.constant dense<0xFF800000> : vector<1x8xf32>
    %47 = vector.multi_reduction <maximumf>, %46, %cst_41 [2] : vector<1x8x8xf32> to vector<1x8xf32>
    %48 = vector.shape_cast %47 : vector<1x8xf32> to vector<1x8x1xf32>
    %49 = vector.broadcast %48 : vector<1x8x1xf32> to vector<1x8x8xf32>
    %50 = arith.subf %46, %49 : vector<1x8x8xf32>
    %51 = math.exp %50 : vector<1x8x8xf32>
    %cst_42 = arith.constant dense<0.000000e+00> : vector<1x8xf32>
    %52 = vector.multi_reduction <add>, %51, %cst_42 [2] : vector<1x8x8xf32> to vector<1x8xf32>
    %53 = vector.shape_cast %52 : vector<1x8xf32> to vector<1x8x1xf32>
    %54 = tpu.reciprocal %53 {approx = true} : vector<1x8x1xf32> -> vector<1x8x1xf32>
    %55 = vector.broadcast %54 : vector<1x8x1xf32> to vector<1x8x8xf32>
    %56 = arith.mulf %51, %55 : vector<1x8x8xf32>
    %57 = arith.truncf %56 : vector<1x8x8xf32> to vector<1x8x8xbf16>
    %58 = vector.extract_strided_slice %43 {offsets = [0, 0, 0], sizes = [1, 8, 8], strides = [1, 1, 1]} : vector<1x8x32xbf16> to vector<1x8x8xbf16>
    "tpu.trace_start"() <{level = 10 : i32, message = "bqk,bkd->bqd"}> : () -> ()
    %cst_43 = arith.constant dense<0.000000e+00> : vector<1x8x8xf32>
    %59 = tpu.matmul %57, %58, %cst_43 {dimension_numbers = #tpu.dot_dimension_numbers<[2], [1], [1], [2], [0, 0, 0, 1, 1, 2], [0], [0]>} : vector<1x8x8xbf16>, vector<1x8x8xbf16>, vector<1x8x8xf32> -> vector<1x8x8xf32>
    "tpu.trace_stop"() : () -> ()
    %60 = vector.extract_strided_slice %37 {offsets = [0, 0, 8], sizes = [1, 8, 8], strides = [1, 1, 1]} : vector<1x8x32xbf16> to vector<1x8x8xbf16>
    %61 = vector.extract_strided_slice %40 {offsets = [0, 0, 8], sizes = [1, 8, 8], strides = [1, 1, 1]} : vector<1x8x32xbf16> to vector<1x8x8xbf16>
    "tpu.trace_start"() <{level = 10 : i32, message = "bqd,bkd->bqk"}> : () -> ()
    %cst_44 = arith.constant dense<0.000000e+00> : vector<1x8x8xf32>
    %62 = tpu.matmul %60, %61, %cst_44 {dimension_numbers = #tpu.dot_dimension_numbers<[2], [2], [1], [1], [0, 0, 0, 1, 1, 1], [0], [0]>} : vector<1x8x8xbf16>, vector<1x8x8xbf16>, vector<1x8x8xf32> -> vector<1x8x8xf32>
    "tpu.trace_stop"() : () -> ()
    %cst_45 = arith.constant dense<0xFF800000> : vector<1x8xf32>
    %63 = vector.multi_reduction <maximumf>, %62, %cst_45 [2] : vector<1x8x8xf32> to vector<1x8xf32>
    %64 = vector.shape_cast %63 : vector<1x8xf32> to vector<1x8x1xf32>
    %65 = vector.broadcast %64 : vector<1x8x1xf32> to vector<1x8x8xf32>
    %66 = arith.subf %62, %65 : vector<1x8x8xf32>
    %67 = math.exp %66 : vector<1x8x8xf32>
    %cst_46 = arith.constant dense<0.000000e+00> : vector<1x8xf32>
    %68 = vector.multi_reduction <add>, %67, %cst_46 [2] : vector<1x8x8xf32> to vector<1x8xf32>
    %69 = vector.shape_cast %68 : vector<1x8xf32> to vector<1x8x1xf32>
    %70 = tpu.reciprocal %69 {approx = true} : vector<1x8x1xf32> -> vector<1x8x1xf32>
    %71 = vector.broadcast %70 : vector<1x8x1xf32> to vector<1x8x8xf32>
    %72 = arith.mulf %67, %71 : vector<1x8x8xf32>
    %73 = arith.truncf %72 : vector<1x8x8xf32> to vector<1x8x8xbf16>
    %74 = vector.extract_strided_slice %43 {offsets = [0, 0, 8], sizes = [1, 8, 8], strides = [1, 1, 1]} : vector<1x8x32xbf16> to vector<1x8x8xbf16>
    "tpu.trace_start"() <{level = 10 : i32, message = "bqk,bkd->bqd"}> : () -> ()
    %cst_47 = arith.constant dense<0.000000e+00> : vector<1x8x8xf32>
    %75 = tpu.matmul %73, %74, %cst_47 {dimension_numbers = #tpu.dot_dimension_numbers<[2], [1], [1], [2], [0, 0, 0, 1, 1, 2], [0], [0]>} : vector<1x8x8xbf16>, vector<1x8x8xbf16>, vector<1x8x8xf32> -> vector<1x8x8xf32>
    "tpu.trace_stop"() : () -> ()
    %76 = vector.extract_strided_slice %37 {offsets = [0, 0, 16], sizes = [1, 8, 8], strides = [1, 1, 1]} : vector<1x8x32xbf16> to vector<1x8x8xbf16>
    %77 = vector.extract_strided_slice %40 {offsets = [0, 0, 16], sizes = [1, 8, 8], strides = [1, 1, 1]} : vector<1x8x32xbf16> to vector<1x8x8xbf16>
    "tpu.trace_start"() <{level = 10 : i32, message = "bqd,bkd->bqk"}> : () -> ()
    %cst_48 = arith.constant dense<0.000000e+00> : vector<1x8x8xf32>
    %78 = tpu.matmul %76, %77, %cst_48 {dimension_numbers = #tpu.dot_dimension_numbers<[2], [2], [1], [1], [0, 0, 0, 1, 1, 1], [0], [0]>} : vector<1x8x8xbf16>, vector<1x8x8xbf16>, vector<1x8x8xf32> -> vector<1x8x8xf32>
    "tpu.trace_stop"() : () -> ()
    %cst_49 = arith.constant dense<0xFF800000> : vector<1x8xf32>
    %79 = vector.multi_reduction <maximumf>, %78, %cst_49 [2] : vector<1x8x8xf32> to vector<1x8xf32>
    %80 = vector.shape_cast %79 : vector<1x8xf32> to vector<1x8x1xf32>
    %81 = vector.broadcast %80 : vector<1x8x1xf32> to vector<1x8x8xf32>
    %82 = arith.subf %78, %81 : vector<1x8x8xf32>
    %83 = math.exp %82 : vector<1x8x8xf32>
    %cst_50 = arith.constant dense<0.000000e+00> : vector<1x8xf32>
    %84 = vector.multi_reduction <add>, %83, %cst_50 [2] : vector<1x8x8xf32> to vector<1x8xf32>
    %85 = vector.shape_cast %84 : vector<1x8xf32> to vector<1x8x1xf32>
    %86 = tpu.reciprocal %85 {approx = true} : vector<1x8x1xf32> -> vector<1x8x1xf32>
    %87 = vector.broadcast %86 : vector<1x8x1xf32> to vector<1x8x8xf32>
    %88 = arith.mulf %83, %87 : vector<1x8x8xf32>
    %89 = arith.truncf %88 : vector<1x8x8xf32> to vector<1x8x8xbf16>
    %90 = vector.extract_strided_slice %43 {offsets = [0, 0, 16], sizes = [1, 8, 8], strides = [1, 1, 1]} : vector<1x8x32xbf16> to vector<1x8x8xbf16>
    "tpu.trace_start"() <{level = 10 : i32, message = "bqk,bkd->bqd"}> : () -> ()
    %cst_51 = arith.constant dense<0.000000e+00> : vector<1x8x8xf32>
    %91 = tpu.matmul %89, %90, %cst_51 {dimension_numbers = #tpu.dot_dimension_numbers<[2], [1], [1], [2], [0, 0, 0, 1, 1, 2], [0], [0]>} : vector<1x8x8xbf16>, vector<1x8x8xbf16>, vector<1x8x8xf32> -> vector<1x8x8xf32>
    "tpu.trace_stop"() : () -> ()
    %92 = vector.extract_strided_slice %37 {offsets = [0, 0, 24], sizes = [1, 8, 8], strides = [1, 1, 1]} : vector<1x8x32xbf16> to vector<1x8x8xbf16>
    %93 = vector.extract_strided_slice %40 {offsets = [0, 0, 24], sizes = [1, 8, 8], strides = [1, 1, 1]} : vector<1x8x32xbf16> to vector<1x8x8xbf16>
    "tpu.trace_start"() <{level = 10 : i32, message = "bqd,bkd->bqk"}> : () -> ()
    %cst_52 = arith.constant dense<0.000000e+00> : vector<1x8x8xf32>
    %94 = tpu.matmul %92, %93, %cst_52 {dimension_numbers = #tpu.dot_dimension_numbers<[2], [2], [1], [1], [0, 0, 0, 1, 1, 1], [0], [0]>} : vector<1x8x8xbf16>, vector<1x8x8xbf16>, vector<1x8x8xf32> -> vector<1x8x8xf32>
    "tpu.trace_stop"() : () -> ()
    %cst_53 = arith.constant dense<0xFF800000> : vector<1x8xf32>
    %95 = vector.multi_reduction <maximumf>, %94, %cst_53 [2] : vector<1x8x8xf32> to vector<1x8xf32>
    %96 = vector.shape_cast %95 : vector<1x8xf32> to vector<1x8x1xf32>
    %97 = vector.broadcast %96 : vector<1x8x1xf32> to vector<1x8x8xf32>
    %98 = arith.subf %94, %97 : vector<1x8x8xf32>
    %99 = math.exp %98 : vector<1x8x8xf32>
    %cst_54 = arith.constant dense<0.000000e+00> : vector<1x8xf32>
    %100 = vector.multi_reduction <add>, %99, %cst_54 [2] : vector<1x8x8xf32> to vector<1x8xf32>
    %101 = vector.shape_cast %100 : vector<1x8xf32> to vector<1x8x1xf32>
    %102 = tpu.reciprocal %101 {approx = true} : vector<1x8x1xf32> -> vector<1x8x1xf32>
    %103 = vector.broadcast %102 : vector<1x8x1xf32> to vector<1x8x8xf32>
    %104 = arith.mulf %99, %103 : vector<1x8x8xf32>
    %105 = arith.truncf %104 : vector<1x8x8xf32> to vector<1x8x8xbf16>
    %106 = vector.extract_strided_slice %43 {offsets = [0, 0, 24], sizes = [1, 8, 8], strides = [1, 1, 1]} : vector<1x8x32xbf16> to vector<1x8x8xbf16>
    "tpu.trace_start"() <{level = 10 : i32, message = "bqk,bkd->bqd"}> : () -> ()
    %cst_55 = arith.constant dense<0.000000e+00> : vector<1x8x8xf32>
    %107 = tpu.matmul %105, %106, %cst_55 {dimension_numbers = #tpu.dot_dimension_numbers<[2], [1], [1], [2], [0, 0, 0, 1, 1, 2], [0], [0]>} : vector<1x8x8xbf16>, vector<1x8x8xbf16>, vector<1x8x8xf32> -> vector<1x8x8xf32>
    "tpu.trace_stop"() : () -> ()
    %108 = tpu.concatenate %59, %75, %91, %107 in 2 : vector<1x8x8xf32>, vector<1x8x8xf32>, vector<1x8x8xf32>, vector<1x8x8xf32> -> vector<1x8x32xf32>
    %109 = vector.shape_cast %108 : vector<1x8x32xf32> to vector<8x32xf32>
    %110 = arith.truncf %109 : vector<8x32xf32> to vector<8x32xbf16>
    %cst_56 = arith.constant dense<0.000000e+00> : vector<8x32xf32>
    %111 = tpu.matmul %110, %10, %cst_56 {dimension_numbers = #tpu.dot_dimension_numbers<[1], [0], [0], [1], [0, 0, 1, 1], [], []>} : vector<8x32xbf16>, vector<32x32xbf16>, vector<8x32xf32> -> vector<8x32xf32>
    %112 = vector.broadcast %12 : vector<1x32xf32> to vector<8x32xf32>
    %113 = arith.addf %111, %112 : vector<8x32xf32>
    %114 = arith.addf %113, %4 : vector<8x32xf32>
    %cst_57 = arith.constant dense<0.000000e+00> : vector<8xf32>
    %115 = vector.multi_reduction <add>, %114, %cst_57 [1] : vector<8x32xf32> to vector<8xf32>
    %116 = vector.shape_cast %115 : vector<8xf32> to vector<8x1xf32>
    %cst_58 = arith.constant 3.200000e+01 : f32
    %117 = vector.broadcast %cst_58 : f32 to vector<8x1xf32>
    %118 = arith.divf %116, %117 : vector<8x1xf32>
    %119 = vector.broadcast %118 : vector<8x1xf32> to vector<8x32xf32>
    %120 = arith.subf %114, %119 : vector<8x32xf32>
    %121 = arith.mulf %120, %120 : vector<8x32xf32>
    %cst_59 = arith.constant dense<0.000000e+00> : vector<8xf32>
    %122 = vector.multi_reduction <add>, %121, %cst_59 [1] : vector<8x32xf32> to vector<8xf32>
    %123 = vector.shape_cast %122 : vector<8xf32> to vector<8x1xf32>
    %cst_60 = arith.constant 3.200000e+01 : f32
    %124 = vector.broadcast %cst_60 : f32 to vector<8x1xf32>
    %125 = arith.divf %123, %124 : vector<8x1xf32>
    %126 = vector.broadcast %118 : vector<8x1xf32> to vector<8x32xf32>
    %127 = arith.subf %114, %126 : vector<8x32xf32>
    %cst_61 = arith.constant 9.99999974E-6 : f32
    %128 = vector.broadcast %cst_61 : f32 to vector<8x1xf32>
    %129 = arith.addf %125, %128 : vector<8x1xf32>
    %130 = math.rsqrt %129 : vector<8x1xf32>
    %131 = vector.broadcast %130 : vector<8x1xf32> to vector<8x32xf32>
    %132 = arith.mulf %127, %131 : vector<8x32xf32>
    %133 = vector.broadcast %14 : vector<1x32xf32> to vector<8x32xf32>
    %134 = arith.mulf %132, %133 : vector<8x32xf32>
    %135 = vector.broadcast %16 : vector<1x32xf32> to vector<8x32xf32>
    %136 = arith.addf %134, %135 : vector<8x32xf32>
    %137 = arith.truncf %136 : vector<8x32xf32> to vector<8x32xbf16>
    %cst_62 = arith.constant dense<0.000000e+00> : vector<8x64xf32>
    %138 = tpu.matmul %137, %18, %cst_62 {dimension_numbers = #tpu.dot_dimension_numbers<[1], [0], [0], [1], [0, 0, 1, 1], [], []>} : vector<8x32xbf16>, vector<32x64xbf16>, vector<8x64xf32> -> vector<8x64xf32>
    %139 = vector.broadcast %20 : vector<1x64xf32> to vector<8x64xf32>
    %140 = arith.addf %138, %139 : vector<8x64xf32>
    %cst_63 = arith.constant 5.000000e-01 : f32
    %141 = vector.broadcast %cst_63 : f32 to vector<8x64xf32>
    %142 = arith.mulf %141, %140 : vector<8x64xf32>
    %cst_64 = arith.constant 0.707106769 : f32
    %143 = vector.broadcast %cst_64 : f32 to vector<8x64xf32>
    %144 = arith.mulf %140, %143 : vector<8x64xf32>
    %145 = math.erf %144 : vector<8x64xf32>
    %cst_65 = arith.constant 1.000000e+00 : f32
    %146 = vector.broadcast %cst_65 : f32 to vector<8x64xf32>
    %147 = arith.addf %146, %145 : vector<8x64xf32>
    %148 = arith.mulf %142, %147 : vector<8x64xf32>
    %149 = arith.truncf %148 : vector<8x64xf32> to vector<8x64xbf16>
    %cst_66 = arith.constant dense<0.000000e+00> : vector<8x32xf32>
    %150 = tpu.matmul %149, %22, %cst_66 {dimension_numbers = #tpu.dot_dimension_numbers<[1], [0], [0], [1], [0, 0, 1, 1], [], []>} : vector<8x64xbf16>, vector<64x32xbf16>, vector<8x32xf32> -> vector<8x32xf32>
    %151 = vector.broadcast %24 : vector<1x32xf32> to vector<8x32xf32>
    %152 = arith.addf %150, %151 : vector<8x32xf32>
    %153 = arith.addf %152, %136 : vector<8x32xf32>
    %cst_67 = arith.constant dense<0.000000e+00> : vector<8xf32>
    %154 = vector.multi_reduction <add>, %153, %cst_67 [1] : vector<8x32xf32> to vector<8xf32>
    %155 = vector.shape_cast %154 : vector<8xf32> to vector<8x1xf32>
    %cst_68 = arith.constant 3.200000e+01 : f32
    %156 = vector.broadcast %cst_68 : f32 to vector<8x1xf32>
    %157 = arith.divf %155, %156 : vector<8x1xf32>
    %158 = vector.broadcast %157 : vector<8x1xf32> to vector<8x32xf32>
    %159 = arith.subf %153, %158 : vector<8x32xf32>
    %160 = arith.mulf %159, %159 : vector<8x32xf32>
    %cst_69 = arith.constant dense<0.000000e+00> : vector<8xf32>
    %161 = vector.multi_reduction <add>, %160, %cst_69 [1] : vector<8x32xf32> to vector<8xf32>
    %162 = vector.shape_cast %161 : vector<8xf32> to vector<8x1xf32>
    %cst_70 = arith.constant 3.200000e+01 : f32
    %163 = vector.broadcast %cst_70 : f32 to vector<8x1xf32>
    %164 = arith.divf %162, %163 : vector<8x1xf32>
    %165 = vector.broadcast %157 : vector<8x1xf32> to vector<8x32xf32>
    %166 = arith.subf %153, %165 : vector<8x32xf32>
    %cst_71 = arith.constant 9.99999974E-6 : f32
    %167 = vector.broadcast %cst_71 : f32 to vector<8x1xf32>
    %168 = arith.addf %164, %167 : vector<8x1xf32>
    %169 = math.rsqrt %168 : vector<8x1xf32>
    %170 = vector.broadcast %169 : vector<8x1xf32> to vector<8x32xf32>
    %171 = arith.mulf %166, %170 : vector<8x32xf32>
    %172 = vector.broadcast %26 : vector<1x32xf32> to vector<8x32xf32>
    %173 = arith.mulf %171, %172 : vector<8x32xf32>
    %174 = vector.broadcast %28 : vector<1x32xf32> to vector<8x32xf32>
    %175 = arith.addf %173, %174 : vector<8x32xf32>
    %176 = vector.shape_cast %175 : vector<8x32xf32> to vector<1x8x32xf32>
    %c0_72 = arith.constant 0 : index
    %c0_73 = arith.constant 0 : index
    %c0_74 = arith.constant 0 : index
    %177 = vector.load %arg16[%c0_72, %c0_73, %c0_74] : memref<1x8x32xf32, #tpu.memory_space<vmem>>, vector<1x8x32xf32>
    tpu.vector_store %arg16[%c0_72, %c0_73, %c0_74], %176 {strides = array<i32>} : memref<1x8x32xf32, #tpu.memory_space<vmem>>, vector<1x8x32xf32>,
    %c1_i32 = arith.constant 1 : i32
    %178 = arith.cmpi eq, %arg1, %c1_i32 : i32
    %179 = arith.extui %178 : i1 to i32
    %c0_i32_75 = arith.constant 0 : i32
    %180 = arith.cmpi ne, %179, %c0_i32_75 : i32
    scf.if %180 {
      %181 = vector.shape_cast %175 : vector<8x32xf32> to vector<1x8x32xf32>
      %c0_76 = arith.constant 0 : index
      %c0_77 = arith.constant 0 : index
      %c0_78 = arith.constant 0 : index
      %182 = vector.load %arg15[%c0_76, %c0_77, %c0_78] : memref<1x8x32xf32, #tpu.memory_space<vmem>>, vector<1x8x32xf32>
      tpu.vector_store %arg15[%c0_76, %c0_77, %c0_78], %181 {strides = array<i32>} : memref<1x8x32xf32, #tpu.memory_space<vmem>>, vector<1x8x32xf32>,
    } else {
    }
    return
  }
  func.func @transform_0(%arg0: i32, %arg1: i32) -> (i32, i32, i32) {
    %c0_i32 = arith.constant 0 : i32
    %c0_i32_0 = arith.constant 0 : i32
    %c0_i32_1 = arith.constant 0 : i32
    return %arg0, %c0_i32, %c0_i32_0 : i32, i32, i32
  }
  func.func @transform_1(%arg0: i32, %arg1: i32) -> (i32, i32, i32) {
    %c0_i32 = arith.constant 0 : i32
    %c0_i32_0 = arith.constant 0 : i32
    %c0_i32_1 = arith.constant 0 : i32
    return %arg1, %c0_i32, %c0_i32_0 : i32, i32, i32
  }
  func.func @transform_2(%arg0: i32, %arg1: i32) -> (i32, i32, i32) {
    %c0_i32 = arith.constant 0 : i32
    %c0_i32_0 = arith.constant 0 : i32
    %c0_i32_1 = arith.constant 0 : i32
    return %arg1, %c0_i32, %c0_i32_0 : i32, i32, i32
  }
  func.func @transform_3(%arg0: i32, %arg1: i32) -> (i32, i32, i32) {
    %c0_i32 = arith.constant 0 : i32
    %c0_i32_0 = arith.constant 0 : i32
    %c0_i32_1 = arith.constant 0 : i32
    return %arg1, %c0_i32, %c0_i32_0 : i32, i32, i32
  }
  func.func @transform_4(%arg0: i32, %arg1: i32) -> (i32, i32, i32) {
    %c0_i32 = arith.constant 0 : i32
    %c0_i32_0 = arith.constant 0 : i32
    %c0_i32_1 = arith.constant 0 : i32
    return %arg1, %c0_i32, %c0_i32_0 : i32, i32, i32
  }
  func.func @transform_5(%arg0: i32, %arg1: i32) -> (i32, i32, i32) {
    %c0_i32 = arith.constant 0 : i32
    %c0_i32_0 = arith.constant 0 : i32
    %c0_i32_1 = arith.constant 0 : i32
    return %arg1, %c0_i32, %c0_i32_0 : i32, i32, i32
  }
  func.func @transform_6(%arg0: i32, %arg1: i32) -> (i32, i32, i32) {
    %c0_i32 = arith.constant 0 : i32
    %c0_i32_0 = arith.constant 0 : i32
    %c0_i32_1 = arith.constant 0 : i32
    return %arg1, %c0_i32, %c0_i32_0 : i32, i32, i32
  }
  func.func @transform_7(%arg0: i32, %arg1: i32) -> (i32, i32, i32) {
    %c0_i32 = arith.constant 0 : i32
    %c0_i32_0 = arith.constant 0 : i32
    %c0_i32_1 = arith.constant 0 : i32
    return %arg1, %c0_i32, %c0_i32_0 : i32, i32, i32
  }
  func.func @transform_8(%arg0: i32, %arg1: i32) -> (i32, i32, i32) {
    %c0_i32 = arith.constant 0 : i32
    %c0_i32_0 = arith.constant 0 : i32
    %c0_i32_1 = arith.constant 0 : i32
    return %arg1, %c0_i32, %c0_i32_0 : i32, i32, i32
  }
  func.func @transform_9(%arg0: i32, %arg1: i32) -> (i32, i32, i32) {
    %c0_i32 = arith.constant 0 : i32
    %c0_i32_0 = arith.constant 0 : i32
    %c0_i32_1 = arith.constant 0 : i32
    return %arg1, %c0_i32, %c0_i32_0 : i32, i32, i32
  }
  func.func @transform_10(%arg0: i32, %arg1: i32) -> (i32, i32, i32) {
    %c0_i32 = arith.constant 0 : i32
    %c0_i32_0 = arith.constant 0 : i32
    %c0_i32_1 = arith.constant 0 : i32
    return %arg1, %c0_i32, %c0_i32_0 : i32, i32, i32
  }
  func.func @transform_11(%arg0: i32, %arg1: i32) -> (i32, i32, i32) {
    %c0_i32 = arith.constant 0 : i32
    %c0_i32_0 = arith.constant 0 : i32
    %c0_i32_1 = arith.constant 0 : i32
    return %arg1, %c0_i32, %c0_i32_0 : i32, i32, i32
  }
  func.func @transform_12(%arg0: i32, %arg1: i32) -> (i32, i32, i32) {
    %c0_i32 = arith.constant 0 : i32
    %c0_i32_0 = arith.constant 0 : i32
    %c0_i32_1 = arith.constant 0 : i32
    return %arg1, %c0_i32, %c0_i32_0 : i32, i32, i32
  }
  func.func @transform_13(%arg0: i32, %arg1: i32) -> (i32, i32, i32) {
    %c0_i32 = arith.constant 0 : i32
    %c0_i32_0 = arith.constant 0 : i32
    %c0_i32_1 = arith.constant 0 : i32
    return %arg0, %c0_i32, %c0_i32_0 : i32, i32, i32
  }
}

</mosaic_0001>

<bundles_post_ra>
// kernel: tpu_custom_call.1
= control target key start
LH: loop header
LB: loop body
LE: loop exit
PB: predicated region body
PF: predicated region fallthrough
CT: control target
= control target key end

     0   :  { %s3112_s0 = inlined_call_operand.hbm [shape: f32[2,8,32], index: 0, kind: input, shape index: {}]   ;;  %s3113_s1 = inlined_call_operand.vmem [shape: bf16[2,32,96], index: 1, kind: input, shape index: {}]   ;;  %s3114_s2 = inlined_call_operand.vmem [shape: f32[2,1,96], index: 2, kind: input, shape index: {}]   ;;  %s3115_s3 = inlined_call_operand.vmem [shape: bf16[2,32,32], index: 3, kind: input, shape index: {}]   ;;  %s3116_s4 = inlined_call_operand.hbm [shape: f32[2,1,32], index: 4, kind: input, shape index: {}]   ;;  %s3117_s5 = inlined_call_operand.hbm [shape: f32[2,1,32], index: 5, kind: input, shape index: {}]   ;;  %s3118_s6 = inlined_call_operand.hbm [shape: f32[2,1,32], index: 6, kind: input, shape index: {}]   ;;  %s3119_s7 = inlined_call_operand.vmem [shape: bf16[2,32,64], index: 7, kind: input, shape index: {}]   ;;  %s3120_s8 = inlined_call_operand.hbm [shape: f32[2,1,64], index: 8, kind: input, shape index: {}]   ;;  %s3121_s9 = inlined_call_operand.vmem [shape: bf16[2,64,32], index: 9, kind: input, shape index: {}]   ;;  %s3122_s10 = inlined_call_operand.vmem [shape: f32[2,1,32], index: 10, kind: input, shape index: {}]   ;;  %s3123_s11 = inlined_call_operand.vmem [shape: f32[2,1,32], index: 11, kind: input, shape index: {}]   ;;  %s3124_s12 = inlined_call_operand.vmem [shape: f32[2,1,32], index: 12, kind: input, shape index: {}]   ;;  %s3125_s13 = inlined_call_operand.hbm [shape: f32[2,8,32], index: 13, kind: output, shape index: {}]  }
   0x1   :  { %3149 = sst [smem:[#allocation32_spill]] %s3112_s0 }
   0x2   :  { %3150 = sst [smem:[#allocation33_spill]] %s3113_s1 }
   0x3   :  { %3151 = sst [smem:[#allocation34_spill]] %s3114_s2 }
   0x4   :  { %3152 = sst [smem:[#allocation35_spill]] %s3115_s3 }
   0x5   :  { %3153 = sst [smem:[#allocation36_spill]] %s3116_s4 }
   0x6   :  { %3154 = sst [smem:[#allocation37_spill]] %s3117_s5 }
   0x7   :  { %3155 = sst [smem:[#allocation38_spill]] %s3118_s6 }
   0x8   :  { %3156 = sst [smem:[#allocation39_spill]] %s3119_s7 }
   0x9   :  { %3157 = sst [smem:[#allocation40_spill]] %s3120_s8 }
   0xa   :  { %3158 = sst [smem:[#allocation41_spill]] %s3121_s9 }
   0xb   :  { %3159 = sst [smem:[#allocation42_spill]] %s3122_s10 }
   0xc   :  { %3160 = sst [smem:[#allocation43_spill]] %s3123_s11 }
   0xd   :  { %3161 = sst [smem:[#allocation44_spill]] %s3124_s12 }
   0xe   :  { %3162 = sst [smem:[#allocation45_spill]] %s3125_s13 }
   0xf   :  { %18 = vsyncpa [#allocation4], 0 }
  0x10   :  { %20 = vsyncpa [#allocation4 + $0x1], 0 }
  0x11   :  { %21 = vsyncpa [#allocation7], 0 }
  0x12   :  { %23 = vsyncpa [#allocation7 + $0x1], 0 }
  0x13   :  { %24 = vsyncpa [#allocation10], 0 }
  0x14   :  { %26 = vsyncpa [#allocation10 + $0x1], 0 }
  0x15   :  { %27 = vsyncpa [#allocation5], 0 }
  0x16   :  { %29 = vsyncpa [#allocation5 + $0x1], 0  ;;  %s2535_s25 = smov 0   ;;  %s2537_s26 = smov 0  }
  0x17   :  { %s2539_s27 = smov 0   ;;  %s2541_s28 = smov 0  }
  0x18   :  { %s2543_s29 = smov 0   ;;  %s2545_s30 = smov 0  }
  0x19   :  { %s2547_s14 = smov 0   ;;  %s2549_s15 = smov 0  }
  0x1a   :  { %s2551_s16 = smov 0   ;;  %s2553_s17 = smov 0  }
  0x1b   :  { %s2555_s18 = smov 0  }
  0x1c LB: > { %3163 = sst [smem:[#allocation17_spill]] %s2405_s26  ;;  %s44_s19 = sadd.s32 1, %s2433_s16  ;;  %s2441_s18 = sphi %s2555_s18, %s35_s18   ;;  %s2437_s17 = sphi %s2553_s17, %s3240_s17   ;;  %s2433_s16 = sphi %s2551_s16, %s3239_s16   ;;  %s2429_s15 = sphi %s2549_s15, %s3238_s15   ;;  %s2425_s14 = sphi %s2547_s14, %s3237_s14   ;;  %s2421_s30 = sphi %s2545_s30, %s3236_s30   ;;  %s2417_s29 = sphi %s2543_s29, %s3235_s29   ;;  %s2413_s28 = sphi %s2541_s28, %s3234_s28   ;;  %s2409_s27 = sphi %s2539_s27, %s3233_s27   ;;  %s2405_s26 = sphi %s2537_s26, %s3232_s26   ;;  %s2401_s25 = sphi %s2535_s25, %s3231_s25  }
  0x1d   : > { %3164 = sst [smem:[#allocation18_spill]] %s2409_s27  ;;  %p3131_p0 = scmp.eq.s32.totalorder %s2441_s18, 0 }
  0x1e   : > { %3165 = sst [smem:[#allocation19_spill]] %s2413_s28  ;;  %p2592_p1 = scmp.ge.s32.totalorder %s44_s19, 2 }
  0x1f   : > { %3166 = sst [smem:[#allocation20_spill]] %s2417_s29  ;;  %s158_s21 = sadd.s32 1, %s2409_s27 }
  0x20   : > { %3167 = sst [smem:[#allocation21_spill]] %s2421_s30  ;;  %p165_p2 = scmp.ne.s32.totalorder %s2409_s27, %s2405_s26 }
  0x21   : > { %3168 = sst [smem:[#allocation22_spill]] %s2425_s14  ;;  %s3242_s19 = smov (%p2592_p1, %s44_s19), 0 }
  0x22   : > { %3169 = sst [smem:[#allocation23_spill]] %s2429_s15  ;;  %p167_p4 = por %p165_p2, %p3131_p0 }
  0x23   : > { %3170 = sst [smem:[#allocation24_spill]] %s2433_s16  ;;  %s155_s22 = ssub.s32 %s2433_s16, %s3242_s19 }
  0x24   : > { %3171 = sst [smem:[#allocation25_spill]] %s2437_s17  ;;  %p3130_p5 = scmp.lt.s32.totalorder %s2441_s18, 4 }
  0x25   : > { %s3172_s20 = scalar_select %p2592_p1, 1, 0 }
  0x26   : > { %3173 = sst [smem:[#allocation26_spill]] %s3242_s19  ;;  %p156_p6 = scmp.eq.s32.totalorder %s155_s22, 0 }
  0x27   : > { %s3132_s23 = sand.u32 1, %s2441_s18   ;;  %s2612_s24 = sand.u32 1, %s2409_s27  }
  0x28   : > { %s2615_s13 = scalar_select %p156_p6, %s2409_s27, %s158_s21  }
  0x29   : > { %s2618_s15 = sshll.u32 %s2433_s16, 4  ;;  %s3175_s4 = sld [smem:[#allocation36_spill]] }
  0x2a   : > { %3174 = sst [smem:[#allocation27_spill]] %s2615_s13  ;;  %s472_s19 = scalar_lea.vmem [#allocation6], %s2612_s24 }
  0x2b   : > { %s479_s22 = sshll.u32 %s472_s19, 4  ;;  %p2631_p7 = pnand %p3130_p5, %p167_p4  ;;  %s2627_s22 = int_to_ptr.vmem [resolvable:$true] %s479_s22 }
  0x2c   : > { %s2639_s11 = scalar_lea.sflag [#allocation7], %s3132_s23 }
  0x2d   : > { %s3176_s21 = scalar_select %p2631_p7, 1, 0 }
  0x2e   : > { %p2645_p11 = pneg %p2631_p7 }
  0x2f   : > { %s2624_s10 = scalar_lea.hbm %s3175_s4, %s2618_s15  ;;  %s2166_s27 = scalar_lea.hbm %s3175_s4, 32 }
  0x30   : > { %s2161_s12 = scalar_lea.hbm %s2624_s10, 16  ;;  %p2167_p2 = scmp.lt.u32.totalorder %s2624_s10, %s3175_s4 }
  0x31   : > { %p2162_p10 = scmp.ne.s32.totalorder %s2624_s10, %s2161_s12  ;;  %p2168_p4 = scmp.lt.u32.totalorder %s2166_s27, %s2161_s12 }
  0x32   : > { %p2170_p5 = scmp.lt.u32.totalorder %s2161_s12, %s2624_s10 }
  0x33   : > { %p2164_p12 = pnand %p2645_p11, %p2162_p10  ;;  %p2169_p6 = por %p2168_p4, %p2167_p2 }
  0x35   : > { %p2165_p13 = pneg %p2164_p12  ;;  %p2171_p3 = por %p2170_p5, %p2169_p6 }
  0x37   : > { %p2172_p0 = pnand %p2171_p3, %p2165_p13 }
  0x39   : > { %2175 = shalt.err (!%p2172_p0)
}
  0x3a   : > { %s2176_s23 = scalar_lea.vmem %s2627_s22, 16  ;;  %s2443_s13 = smov [#allocation6]  }
  0x3b   : > { %p2177_p10 = scmp.ne.s32.totalorder %s2627_s22, %s2176_s23  ;;  %s2181_s19 = sshll.u32 %s2443_s13, 4  ;;  %s2182_s19 = int_to_ptr.vmem [resolvable:$false] %s2181_s19 }
  0x3c   : > { %s2183_s7 = scalar_lea.vmem %s2182_s19, 32  ;;  %p2184_p9 = scmp.lt.s32.totalorder %s2627_s22, %s2182_s19 }
  0x3d   : > { %p2179_p12 = pnand %p2177_p10, %p2645_p11  ;;  %p2185_p1 = scmp.lt.s32.totalorder %s2183_s7, %s2176_s23 }
  0x3f   : > { %p2180_p8 = pneg %p2179_p12  ;;  %p2186_p2 = por %p2185_p1, %p2184_p9 }
  0x41   : > { %p2187_p4 = pnand %p2186_p2, %p2180_p8 }
  0x43   : > { %2190 = shalt.err (!%p2187_p4)
}
  0x44   : > { %2009 = dma.hbm_to_vmem [thread:$0]  (!%p2631_p7), %s2624_s10, 16, %s2627_s22, %s2639_s11  }
  0x45   : > { %p3178_p0 = scmp.lt.s32.totalorder %s2441_s18, 5  ;;  %p3179_p3 = scmp.ge.s32.totalorder %s2441_s18, 1 }
  0x46   : > { %s3181_s6 = sld [smem:[#allocation38_spill]]  ;;  %s506_s13 = scalar_lea.vmem [#allocation9], %s2612_s24 }
  0x47   : > { %p2673_p5 = pnand %p3179_p3, %p3178_p0  ;;  %s513_s19 = sshll.u32 %s506_s13, 4  ;;  %s514_s19 = int_to_ptr.vmem [resolvable:$true] %s513_s19 }
  0x48   : > { %s3182_s7 = sand.u32 1, %s2441_s18  }
  0x49   : > { %s3180_s9 = scalar_select %p2673_p5, 1, 0 }
  0x4a   : > { %s2686_s10 = scalar_lea.sflag [#allocation10], %s3182_s7 }
  0x4c   : > { %s2681_s12 = scalar_lea.hbm %s3181_s6, %s2618_s15  ;;  %s2196_s27 = scalar_lea.hbm %s3181_s6, 32 }
  0x4d   : > { %s2191_s22 = scalar_lea.hbm %s2681_s12, 16  ;;  %p2197_p13 = scmp.lt.u32.totalorder %s2681_s12, %s3181_s6 }
  0x4e   : > { %p2192_p1 = scmp.ne.s32.totalorder %s2681_s12, %s2191_s22  ;;  %p2198_p6 = scmp.lt.u32.totalorder %s2196_s27, %s2191_s22 }
  0x4f   : > { %p2200_p12 = scmp.lt.u32.totalorder %s2191_s22, %s2681_s12 }
  0x50   : > { %p2194_p8 = pnand %p2192_p1, %p2645_p11  ;;  %p2199_p10 = por %p2198_p6, %p2197_p13 }
  0x52   : > { %p2195_p9 = pneg %p2194_p8  ;;  %p2201_p2 = por %p2200_p12, %p2199_p10 }
  0x54   : > { %p2202_p4 = pnand %p2201_p2, %p2195_p9 }
  0x56   : > { %2205 = shalt.err (!%p2202_p4)
}
  0x57   : > { %s2206_s13 = scalar_lea.vmem %s514_s19, 16  ;;  %s2444_s7 = smov [#allocation9]  }
  0x58   : > { %p2207_p0 = scmp.ne.s32.totalorder %s514_s19, %s2206_s13  ;;  %s2211_s2 = sshll.u32 %s2444_s7, 4  ;;  %s2212_s2 = int_to_ptr.vmem [resolvable:$false] %s2211_s2 }
  0x59   : > { %s2213_s3 = scalar_lea.vmem %s2212_s2, 32  ;;  %p2214_p8 = scmp.lt.s32.totalorder %s514_s19, %s2212_s2 }
  0x5a   : > { %p2209_p3 = pnand %p2207_p0, %p2645_p11  ;;  %p2215_p5 = scmp.lt.s32.totalorder %s2213_s3, %s2206_s13 }
  0x5c   : > { %p2210_p1 = pneg %p2209_p3  ;;  %p2216_p7 = por %p2215_p5, %p2214_p8 }
  0x5e   : > { %p2217_p6 = pnand %p2216_p7, %p2210_p1 }
  0x60   : > { %2220 = shalt.err (!%p2217_p6)
}
  0x61   : > { %p3183_p13 = scmp.ne.s32.totalorder %s3176_s21, 0  ;;  %s2707_s1 = sadd.s32 4294967295, %s2441_s18  }
  0x62   : > { %s1817_s2 = sadd.s32 4294967294, %s2441_s18   ;;  %s47_s4 = sadd.s32 1, %s2437_s17 }
  0x63   : > { %2015 = dma.hbm_to_vmem [thread:$0]  (!%p3183_p13), %s2681_s12, 16, %s514_s19, %s2686_s10  }
  0x64   : > { %p3184_p7 = scmp.ne.s32.totalorder %s3172_s20, 0  ;;  %s54_s22 = sadd.s32 1, %s2421_s30 }
  0x65   : > { %p61_p5 = scmp.ne.s32.totalorder %s2421_s30, %s2417_s29  ;;  %p67_p10 = scmp.ne.s32.totalorder %s2417_s29, %s2413_s28 }
  0x66   : > { %s3244_s4 = smov (!%p3184_p7, %s47_s4), %s2437_s17  ;;  %p3185_p12 = scmp.eq.s32.totalorder %s2441_s18, 0 }
  0x67   : > { %p49_p9 = scmp.ge.s32.totalorder %s3244_s4, 2  ;;  %p68_p4 = scmp.eq.s32.totalorder %s2707_s1, 0 }
  0x68   : > { %p2721_p2 = por %p3185_p12, %p61_p5  ;;  %p3189_p3 = scmp.ne.s32.totalorder %s2405_s26, %s2401_s25 }
  0x69   : > { %s3246_s4 = smov (%p49_p9, %s3244_s4), 0  ;;  %p2731_p0 = por %p68_p4, %p67_p10 }
  0x6a   : > { %3187 = sst [smem:[#allocation28_spill]] %s3246_s4  ;;  %p2738_p1 = por %p3189_p3, %p68_p4 }
  0x6b   : > { %s3188_s20 = scalar_select %p2731_p0, 1, 0 }
  0x6c   : > { %s3190_s19 = scalar_select %p2738_p1, 1, 0 }
  0x6d   : > { %s51_s27 = ssub.s32 %s2437_s17, %s3246_s4  ;;  %p403_p8 = scmp.eq.s32.totalorder %s2707_s1, 3 }
  0x6e   : > { %3191 = sst [smem:[#allocation29_spill]] %s3190_s19  ;;  %p52_p6 = scmp.eq.s32.totalorder %s51_s27, 0 }
  0x6f   : > { %p409_p7 = scmp.eq.s32.totalorder %s1817_s2, 3  ;;  %p2745_p9 = por %p403_p8, %p61_p5 }
  0x70   : > { %s429_s13 = sand.u32 1, %s2421_s30   ;;  %s1821_s6 = sshll.u32 %s2437_s17, 7 }
  0x71   : > { %s3192_s23 = scalar_select %p2745_p9, 1, 0 }
  0x72   : > { %s2751_s7 = scalar_select %p52_p6, %s2421_s30, %s54_s22  }
  0x73   : > { %p2756_p12 = por %p409_p7, %p67_p10  ;;  %s1820_s25 = sshll.u32 %s429_s13, 3 }
  0x74   : > { %3193 = sst [smem:[#allocation30_spill]] %s2751_s7  ;;  %s3196_s0 = sld [smem:[#allocation32_spill]] }
  0x75   : > { %s3194_s3 = scalar_select %p2756_p12, 1, 0 }
  0x76   : > { %s433_s2 = scalar_lea.vmem [#allocation3], %s1820_s25  ;;  %p3197_p5 = scmp.lt.s32.totalorder %s2441_s18, 4 }
  0x77   : > { %3195 = sst [smem:[#allocation31_spill]] %s3194_s3  ;;  %s440_s27 = sshll.u32 %s433_s2, 4  ;;  %s2774_s27 = int_to_ptr.vmem [resolvable:$true] %s440_s27 }
  0x78   : > { %p2770_p4 = pnand %p3197_p5, %p2721_p2  ;;  %s3199_s5 = sld [smem:[#allocation37_spill]] }
  0x79   : > { %s430_s19 = scalar_lea.sflag [#allocation4], %s429_s13 }
  0x7a   : > { %s2764_s4 = scalar_lea.hbm %s3196_s0, %s1821_s6  ;;  %p2223_p3 = pneg %p2770_p4 }
  0x7b   : > { %s2221_s7 = scalar_lea.hbm %s2764_s4, 128  ;;  %s2226_s2 = scalar_lea.hbm %s3196_s0, 256 }
  0x7c   : > { %p2222_p10 = scmp.ne.s32.totalorder %s2764_s4, %s2221_s7  ;;  %p2227_p6 = scmp.lt.u32.totalorder %s2764_s4, %s3196_s0 }
  0x7d   : > { %p2228_p7 = scmp.lt.u32.totalorder %s2226_s2, %s2221_s7  ;;  %p2230_p12 = scmp.lt.u32.totalorder %s2221_s7, %s2764_s4 }
  0x7e   : > { %s2780_s6 = scalar_lea.hbm %s3199_s5, %s2618_s15  ;;  %p2224_p2 = pnand %p2223_p3, %p2222_p10 }
  0x7f   : > { %p2229_p5 = por %p2228_p7, %p2227_p6 }
  0x80   : > { %p2225_p8 = pneg %p2224_p2 }
  0x81   : > { %p2231_p9 = por %p2230_p12, %p2229_p5 }
  0x83   : > { %p2232_p1 = pnand %p2231_p9, %p2225_p8 }
  0x85   : > { %2235 = shalt.err (!%p2232_p1)
}
  0x86   : > { %s2236_s17 = scalar_lea.vmem %s2774_s27, 128  ;;  %s2445_s13 = smov [#allocation3]  }
  0x87   : > { %p2237_p10 = scmp.ne.s32.totalorder %s2774_s27, %s2236_s17  ;;  %s2241_s14 = sshll.u32 %s2445_s13, 4  ;;  %s2242_s14 = int_to_ptr.vmem [resolvable:$false] %s2241_s14 }
  0x88   : > { %s2243_s30 = scalar_lea.vmem %s2242_s14, 256  ;;  %p2244_p13 = scmp.lt.s32.totalorder %s2774_s27, %s2242_s14 }
  0x89   : > { %p2239_p2 = pnand %p2237_p10, %p2223_p3  ;;  %p2245_p6 = scmp.lt.s32.totalorder %s2243_s30, %s2236_s17 }
  0x8b   : > { %p2240_p0 = pneg %p2239_p2  ;;  %p2246_p7 = por %p2245_p6, %p2244_p13 }
  0x8d   : > { %p2247_p12 = pnand %p2246_p7, %p2240_p0 }
  0x8f   : > { %2250 = shalt.err (!%p2247_p12)
}
  0x90   : > { %2006 = dma.hbm_to_vmem [thread:$0]  (!%p2770_p4), %s2764_s4, 128, %s2774_s27, %s430_s19  }
  0x91   : > { %s489_s7 = scalar_lea.vmem [#allocation8], %s2612_s24  ;;  %s3200_s8 = sld [smem:[#allocation40_spill]] }
  0x92   : > { %s496_s3 = sshll.u32 %s489_s7, 4  ;;  %s2251_s17 = scalar_lea.hbm %s2780_s6, 16  ;;  %s497_s3 = int_to_ptr.vmem [resolvable:$true] %s496_s3 }
  0x93   : > { %p2252_p13 = scmp.ne.s32.totalorder %s2780_s6, %s2251_s17  ;;  %s2256_s14 = scalar_lea.hbm %s3199_s5, 32 }
  0x94   : > { %p2257_p9 = scmp.lt.u32.totalorder %s2780_s6, %s3199_s5  ;;  %p2258_p4 = scmp.lt.u32.totalorder %s2256_s14, %s2251_s17 }
  0x95   : > { %p2254_p0 = pnand %p2252_p13, %p2645_p11  ;;  %p2260_p8 = scmp.lt.u32.totalorder %s2251_s17, %s2780_s6 }
  0x96   : > { %p2259_p3 = por %p2258_p4, %p2257_p9 }
  0x97   : > { %s2812_s2 = scalar_lea.hbm %s3200_s8, %s2618_s15  ;;  %p2255_p1 = pneg %p2254_p0 }
  0x98   : > { %p2261_p5 = por %p2260_p8, %p2259_p3 }
  0x9a   : > { %p2262_p10 = pnand %p2261_p5, %p2255_p1 }
  0x9c   : > { %2265 = shalt.err (!%p2262_p10)
}
  0x9d   : > { %s2266_s15 = scalar_lea.vmem %s497_s3, 16  ;;  %s2446_s4 = smov [#allocation8]  }
  0x9e   : > { %p2267_p2 = scmp.ne.s32.totalorder %s497_s3, %s2266_s15  ;;  %s2271_s27 = sshll.u32 %s2446_s4, 4  ;;  %s2272_s27 = int_to_ptr.vmem [resolvable:$false] %s2271_s27 }
  0x9f   : > { %s2273_s19 = scalar_lea.vmem %s2272_s27, 32  ;;  %p2274_p12 = scmp.lt.s32.totalorder %s497_s3, %s2272_s27 }
  0xa0   : > { %p2269_p6 = pnand %p2267_p2, %p2645_p11  ;;  %p2275_p13 = scmp.lt.s32.totalorder %s2273_s19, %s2266_s15 }
  0xa2   : > { %p2270_p7 = pneg %p2269_p6  ;;  %p2276_p0 = por %p2275_p13, %p2274_p12 }
  0xa4   : > { %p2277_p4 = pnand %p2276_p0, %p2270_p7 }
  0xa6   : > { %2280 = shalt.err (!%p2277_p4)
}
  0xa7   : > { %p3201_p9 = scmp.ne.s32.totalorder %s3176_s21, 0  ;;  %s531_s0 = scalar_lea.vmem [#allocation11], %s2612_s24 }
  0xa8   : > { %s538_s7 = sshll.u32 %s531_s0, 4  ;;  %s2281_s12 = scalar_lea.hbm %s2812_s2, 16  ;;  %s539_s7 = int_to_ptr.vmem [resolvable:$true] %s538_s7 }
  0xa9   : > { %2012 = dma.hbm_to_vmem [thread:$0]  (!%p3201_p9), %s2780_s6, 16, %s497_s3, %s2639_s11  }
  0xaa   : > { %p2282_p1 = scmp.ne.s32.totalorder %s2812_s2, %s2281_s12  ;;  %s2286_s22 = scalar_lea.hbm %s3200_s8, 32 }
  0xab   : > { %p2287_p5 = scmp.lt.u32.totalorder %s2812_s2, %s3200_s8  ;;  %p2288_p10 = scmp.lt.u32.totalorder %s2286_s22, %s2281_s12 }
  0xac   : > { %p2284_p3 = pnand %p2282_p1, %p2645_p11  ;;  %p2290_p6 = scmp.lt.u32.totalorder %s2281_s12, %s2812_s2 }
  0xad   : > { %p2289_p2 = por %p2288_p10, %p2287_p5 }
  0xae   : > { %p2285_p8 = pneg %p2284_p3 }
  0xaf   : > { %p2291_p7 = por %p2290_p6, %p2289_p2 }
  0xb1   : > { %p2292_p12 = pnand %p2291_p7, %p2285_p8 }
  0xb3   : > { %2295 = shalt.err (!%p2292_p12)
}
  0xb4   : > { %s2296_s24 = scalar_lea.vmem %s539_s7, 16  ;;  %s2447_s11 = smov [#allocation11]  }
  0xb5   : > { %p2297_p13 = scmp.ne.s32.totalorder %s539_s7, %s2296_s24  ;;  %s2301_s6 = sshll.u32 %s2447_s11, 4  ;;  %s2302_s6 = int_to_ptr.vmem [resolvable:$false] %s2301_s6 }
  0xb6   : > { %s2303_s3 = scalar_lea.vmem %s2302_s6, 32  ;;  %p2304_p1 = scmp.lt.s32.totalorder %s539_s7, %s2302_s6 }
  0xb7   : > { %p2299_p0 = pnand %p2297_p13, %p2645_p11  ;;  %p2305_p3 = scmp.lt.s32.totalorder %s2303_s3, %s2296_s24 }
  0xb9   : > { %p2300_p4 = pneg %p2299_p0  ;;  %p2306_p9 = por %p2305_p3, %p2304_p1 }
  0xbb   : > { %p2307_p5 = pnand %p2306_p9, %p2300_p4 }
  0xbd   : > { %2310 = shalt.err (!%p2307_p5)
}
  0xbe   : > { %p3202_p10 = scmp.ne.s32.totalorder %s3176_s21, 0  ;;  %p3203_p8 = scmp.ne.s32.totalorder %s3180_s9, 0 }
  0xbf   : > { %s2854_s16 = sand.u32 (!%p3203_p8), 1, %s2417_s29   ;;  %p3204_p11 = scmp.ne.s32.totalorder (!%p3203_p8), %s3188_s20, 0 }
  0xc0   : > { %2018 = dma.hbm_to_vmem [thread:$0]  (!%p3202_p10), %s2812_s2, 16, %s539_s7, %s2686_s10  }
  0xc1   : > { %573 = sbr.rel (%p3203_p8) target bundleno = 2817 (0xb01), region = 72  ;;  %s1827_s30 = sshll.u32 (!%p3203_p8), %s2854_s16, 3 }
  0xc2   : > { %s576_s15 = scalar_lea.sflag (!%p3203_p8), [#allocation4], %s2854_s16  ;;  %s579_s4 = scalar_lea.vmem (!%p3203_p8), [#allocation3], %s1827_s30 }
  0xc8   : > { %2384 = dma.done.wait (%p3204_p11), %s576_s15, 128  }
  0xc9   : > { %2386 = vsyncadd (%p3204_p11), %s576_s15, 4294967168  ;;  %s3205_s21 = sld [smem:[#allocation29_spill]]  ;;  %s584_s10 = sand.u32 1, %s2707_s1  }
  0xca   : > { %s2864_s9 = sand.u32 1, %s2405_s26   ;;  %s585_s2 = scalar_lea.sflag [#allocation7], %s584_s10 }
  0xcf   : > { %p3206_p9 = scmp.ne.s32.totalorder %s3205_s21, 0 }
  0xd1   : > { %2388 = dma.done.wait (%p3206_p9), %s585_s2, 32  }
  0xd2   : > { %2390 = vsyncadd (%p3206_p9), %s585_s2, 4294967264  ;;  %s601_s20 = scalar_lea.sflag [#allocation10], %s584_s10 }
  0xd3   : > { %2392 = dma.done.wait (%p3206_p9), %s601_s20, 32  }
  0xd4   : > { %2394 = vsyncadd (%p3206_p9), %s601_s20, 4294967264  ;;  %s3207_s1 = sld [smem:[#allocation22_spill]]  ;;  %s3210_s21 = sld [smem:[#allocation35_spill]] }
  0xd5   : > { %s3209_s11 = sld [smem:[#allocation33_spill]]  ;;  %s3211_s0 = sld [smem:[#allocation39_spill]] }
  0xd6   : > { %s3212_s29 = sld [smem:[#allocation41_spill]]  ;;  %s3213_s14 = sld [smem:[#allocation42_spill]] }
  0xd7   : > { %s3214_s3 = sld [smem:[#allocation43_spill]]  ;;  %s3215_s28 = sld [smem:[#allocation44_spill]] }
  0xda   : > { %p702_p2 = scmp.lt.s32.totalorder %s3207_s1, 1  ;;  %p1837_p6 = scmp.ne.s32.totalorder %s3207_s1, 0 }
  0xdb   : > { %v739_v0 = vld [vmem:[%s579_s4] sm:$0xff] (!%p1837_p6)  ;;  %vm740_vm0 = vcmask (!%p1837_p6), 261120  }
  0xdc   : > { %s2879_s7 = scalar_select %p702_p2, %s3207_s1, 1 }
  0xdd   : > { %738 = sbr.rel (%p1837_p6) target bundleno = 228 (0xe4), region = 96  ;;  %741 = vst.msk [vmem:[#allocation2] sm:$0xff] (!%p1837_p6), %vm740_vm0, %v739_v0 }
  0xde   : > { %s1873_s12 = sshll.u32 %s2879_s7, 4  ;;  %s1876_s27 = sshll.u32 %s2879_s7, 5 }
  0xdf   : > { %s706_s6 = scalar_lea.vmem %s3209_s11, %s1873_s12  ;;  %s2892_s10 = scalar_lea.vmem %s3210_s21, %s1873_s12 }
  0xe0   : > { %s2897_s19 = scalar_lea.vmem %s3211_s0, %s1873_s12  ;;  %s2903_s25 = scalar_lea.vmem %s3212_s29, %s1876_s27 }
  0xe1   : > { %s727_s24 = scalar_lea.vmem %s3213_s14, %s2879_s7  ;;  %s730_s15 = scalar_lea.vmem %s3214_s3, %s2879_s7 }
  0xe2   : > { %s733_s2 = scalar_lea.vmem %s3215_s28, %s2879_s7  ;;  %s611_s0 = scalar_lea.vmem [#allocation11], %s2864_s9 }
  0xe3   : > { %s2918_s12 = scalar_lea.vmem [#allocation12], %s1827_s30 }
  0xe4 PF: > { %v2129_v1 = vld [vmem:[%s706_s6] sm:$0xff]   ;;  %v2448_v2 = vmov 0.0   ;;  %v2130_v3 = vld [vmem:[%s706_s6 + $0x8] sm:$0xff]   ;;  %vm2449_vm1 = vmmov 0   ;;  %vm790_vm2 = vcmask 261120   ;;  %s3216_s26 = sld [smem:[#allocation34_spill]] }
  0xe5   : > { %1907 = vmatprep.subr.bf16.mxu0 %v2448_v2  ;;  %1915 = vmatprep.subr.bf16.mxu1 %v2448_v2  ;;  %v2925_v4 = vld [vmem:[#allocation2] sm:$0xff]  ;;  %s2450_s29 = smov 96   ;;  %s2451_s30 = smov 120   ;;  %vm840_vm3 = vcmask 64512   ;;  %vm904_vm4 = vcmask 1043456   ;;  %vm1292_vm5 = vcmask 130048  }
  0xe6   : > { %1908 = vmatpush3.bf16.msra.mxu0 %v2129_v1  ;;  %1911 = vmatprep.mubr.msk.bf16.mxu0 %vm2449_vm1, %v2448_v2  ;;  %v771_v5 = vpack.c.bf16 %v2925_v4, %v2925_v4  ;;  %s2452_s4 = smov 88   ;;  %s2453_s27 = smov 80   ;;  %vm1294_vm6 = vcmask 195584   ;;  %vm1485_vm7 = vcmask 523264  }
  0xe7   : > { %1909 = vmatprep.subr.bf16.mxu0 %v2448_v2  ;;  %1917 = vmatprep.mubr.msk.bf16.mxu1 %vm2449_vm1, %v2448_v2  ;;  %s2454_s1 = smov 112   ;;  %s2455_s13 = smov 72  }
  0xe8   : > { %s2456_s6 = smov 104   ;;  %s2457_s20 = smov 56  }
  0xe9   : > { %s2458_s17 = smov 64   ;;  %s2459_s22 = smov 40  }
  0xea   : > { %1910 = vmatpush3.bf16.msra.mxu0 %v2130_v3  ;;  %s3217_s28 = scalar_lea.vmem %s3216_s26, %s2879_s7  ;;  %s2460_s14 = smov 48  }
  0xeb   : > { %1921 = vmatprep.subr.bf16.mxu0 %v2448_v2  ;;  %v1838_v6 = vld [vmem:[%s3217_s28] ss:$0 sm:$0xff]  ;;  %s2461_s11 = smov 8   ;;  %s2462_s3 = smov 16  }
  0xec   : > { %s2463_s21 = smov 24   ;;  %s3219_s5 = scalar_lea.vmem [#allocation8], %s2864_s9 }
  0xed   : > { %1912 = vmatmul.mubr.msk.bf16.vlgmr.msra.gmra.mrb[0].mxu0 %vm790_vm2, %v771_v5  ;;  %s3220_s8 = scalar_lea.vmem [#allocation9], %s2864_s9 }
  0xee   : > { %1923 = vmatprep.mubr.msk.bf16.mxu0 %vm2449_vm1, %v2448_v2 }
 0x1c0   : > { %v828_v7 = vpop.f32.mrb[0].mxu0 }
 0x1c1   : > { %v829_v8 = vadd.f32 %v1838_v6, %v828_v7  ;;  %v1913_v9 = vpop.f32.mrb[1].mxu0 }
 0x1c2   : > { %v831_v10 = vpop.f32.mrb[2].mxu0 }
 0x1c3   : > { %v834_v11 = vmul.f32 0.35355338, %v829_v8  ;;  %v2941_v12 = vpack.c.bf16 %v829_v8, %v829_v8  ;;  %v1914_v13 = vpop.f32.mrb[3].mxu0 }
 0x1c5   : > { %v835_v14 = vpack.c.bf16 %v834_v11, %v834_v11  ;;  %838 = vrot.lane.b32.xlu0 %v2941_v12, %s2450_s29 }
 0x1c7   : > { %949 = vrot.lane.b32.xlu1 %v835_v14, %s2451_s30 }
 0x1c9   : > { %951 = vrot.lane.b32.xlu0 %v2941_v12, %s2452_s4  ;;  %s3224_s4 = sld [smem:[#allocation22_spill]] }
 0x1cb   : > { %1061 = vrot.lane.b32.xlu1 %v2941_v12, %s2453_s27 }
 0x1cd   : > { %1059 = vrot.lane.b32.xlu0 %v835_v14, %s2454_s1 }
 0x1cf   : > { %1171 = vrot.lane.b32.xlu1 %v2941_v12, %s2455_s13  ;;  %p1868_p7 = scmp.ne.s32.totalorder %s3224_s4, 1 }
 0x1d1   : > { %1169 = vrot.lane.b32.xlu0 %v835_v14, %s2456_s6 }
 0x237   : > { %v839_v15 = vpop.permute.xlu0 %838 }
 0x238   : > { %v845_v16 = vsel %vm840_vm3, %v839_v15, 0 }
 0x239   : > { %1916 = vmatpush3.bf16.xpose.msra.mxu1 %v845_v16  ;;  %v950_v18 = vpop.permute.xlu1 %949 }
 0x23a   : > { %1927 = vmatprep.subr.bf16.mxu1 %v2448_v2 }
 0x23b   : > { %v952_v17 = vpop.permute.xlu0 %951 }
 0x23c   : > { %v957_v19 = vsel %vm840_vm3, %v952_v17, 0 }
 0x23d   : > { %v1062_v20 = vpop.permute.xlu1 %1061 }
 0x23e   : > { %v1067_v21 = vsel %vm840_vm3, %v1062_v20, 0 }
 0x23f   : > { %v1060_v23 = vpop.permute.xlu0 %1059 }
 0x240   : > { %1918 = vmatmul.mubr.msk.bf16.vlgmr.msra.gmra.mrb[0].mxu1 %vm840_vm3, %v835_v14 }
 0x241   : > { %1928 = vmatpush3.bf16.xpose.msra.mxu1 %v957_v19  ;;  %1929 = vmatprep.mubr.msk.bf16.mxu1 %vm2449_vm1, %v2448_v2  ;;  %v1172_v22 = vpop.permute.xlu1 %1171 }
 0x242   : > { %1939 = vmatprep.subr.bf16.mxu1 %v2448_v2  ;;  %v1177_v24 = vsel %vm840_vm3, %v1172_v22, 0 }
 0x243   : > { %v1170_v25 = vpop.permute.xlu0 %1169 }
 0x248   : > { %1930 = vmatmul.mubr.msk.bf16.vlgmr.msra.gmra.mrb[4].mxu1 %vm840_vm3, %v950_v18 }
 0x249   : > { %1940 = vmatpush3.bf16.xpose.msra.mxu1 %v1067_v21  ;;  %1941 = vmatprep.mubr.msk.bf16.mxu1 %vm2449_vm1, %v2448_v2 }
 0x24a   : > { %1951 = vmatprep.subr.bf16.mxu1 %v2448_v2 }
 0x250   : > { %1942 = vmatmul.mubr.msk.bf16.vlgmr.msra.gmra.mrb[8].mxu1 %vm840_vm3, %v1060_v23 }
 0x251   : > { %1952 = vmatpush3.bf16.xpose.msra.mxu1 %v1177_v24  ;;  %1953 = vmatprep.mubr.msk.bf16.mxu1 %vm2449_vm1, %v2448_v2 }
 0x252   : > { %1963 = vmatprep.subr.bf16.mxu1 %v2448_v2 }
 0x258   : > { %1954 = vmatmul.mubr.msk.bf16.vlgmr.msra.gmra.mrb[12].mxu1 %vm840_vm3, %v1170_v25 }
 0x259   : > { %1967 = vmatprep.mubr.msk.bf16.mxu1 %vm2449_vm1, %v2448_v2 }
 0x313   : > { %v881_v26 = vpop.f32.mrb[0].mxu1 }
 0x314   : > { %v1919_v27 = vpop.f32.mrb[1].mxu1  ;;  %v887_v28 = vsel %vm840_vm3, %v881_v26, -inf }
 0x315   : > { %888 = vmax.xlane.f32.xlu1 %v887_v28  ;;  %v884_v29 = vpop.f32.mrb[2].mxu1 }
 0x316   : > { %v1920_v30 = vpop.f32.mrb[3].mxu1 }
 0x31b   : > { %v993_v31 = vpop.f32.mrb[4].mxu1 }
 0x31c   : > { %v1931_v32 = vpop.f32.mrb[5].mxu1  ;;  %v999_v33 = vsel %vm840_vm3, %v993_v31, -inf }
 0x31d   : > { %1000 = vmax.xlane.f32.xlu0 %v999_v33  ;;  %v996_v34 = vpop.f32.mrb[6].mxu1 }
 0x31e   : > { %v1932_v35 = vpop.f32.mrb[7].mxu1 }
 0x323   : > { %v1103_v36 = vpop.f32.mrb[8].mxu1 }
 0x324   : > { %v1943_v37 = vpop.f32.mrb[9].mxu1  ;;  %v1109_v38 = vsel %vm840_vm3, %v1103_v36, -inf }
 0x325   : > { %1110 = vmax.xlane.f32.xlu0 %v1109_v38  ;;  %v1106_v39 = vpop.f32.mrb[10].mxu1  ;;  %v2132_v37 = vld [vmem:[%s2892_s10 + $0x8] sm:$0xff]  }
 0x326   : > { %v1944_v40 = vpop.f32.mrb[11].mxu1 }
 0x32b   : > { %v1213_v41 = vpop.f32.mrb[12].mxu1 }
 0x32c   : > { %v1955_v42 = vpop.f32.mrb[13].mxu1  ;;  %v1219_v43 = vsel %vm840_vm3, %v1213_v41, -inf }
 0x32d   : > { %1220 = vmax.xlane.f32.xlu1 %v1219_v43  ;;  %v1216_v44 = vpop.f32.mrb[14].mxu1 }
 0x32e   : > { %v1956_v45 = vpop.f32.mrb[15].mxu1 }
 0x3a2   : > { %v889_v46 = vpop.xlane.xlu1 %888 }
 0x3a3   : > { %v890_v47 = vsub.f32 %v881_v26, %v889_v46 }
 0x3a5   : > { %v891_v48 = vmul.f32 1.442695, %v890_v47 }
 0x3a7   : > { %2139 = vpow2.f32 %v891_v48 }
 0x3aa   : > { %v1001_v49 = vpop.xlane.xlu0 %1000 }
 0x3ab   : > { %v1002_v50 = vsub.f32 %v993_v31, %v1001_v49 }
 0x3ad   : > { %v1003_v51 = vmul.f32 1.442695, %v1002_v50 }
 0x3af   : > { %2141 = vpow2.f32 %v1003_v51 }
 0x3b1   : > { %v2140_v52 = vpop.eup %2139 }
 0x3b2   : > { %v1111_v53 = vpop.xlane.xlu0 %1110  ;;  %v893_v54 = vsel %vm840_vm3, %v2140_v52, 0.0 }
 0x3b3   : > { %v1112_v55 = vsub.f32 %v1103_v36, %v1111_v53  ;;  %894 = vadd.xlane.f32.xlu0 %v893_v54  ;;  %v2131_v36 = vld [vmem:[%s2892_s10] sm:$0xff]   ;;  %s3218_s10 = scalar_lea.vmem [#allocation6], %s2864_s9 }
 0x3b4   : > { %1964 = vmatpush3.bf16.msra.mxu1 %v2131_v36  ;;  %v1850_v53 = vld [vmem:[%s3218_s10] ss:$0 sm:$0xff] }
 0x3b5   : > { %v1113_v56 = vmul.f32 1.442695, %v1112_v55  ;;  %1965 = vmatprep.subr.bf16.mxu1 %v2448_v2 }
 0x3b7   : > { %2143 = vpow2.f32 %v1113_v56 }
 0x3b8   : > { %1966 = vmatpush3.bf16.msra.mxu1 %v2132_v37 }
 0x3b9   : > { %v2142_v57 = vpop.eup %2141  ;;  %1979 = vmatprep.subr.bf16.mxu1 %v2448_v2 }
 0x3ba   : > { %v1005_v58 = vsel %vm840_vm3, %v2142_v57, 0.0  ;;  %v1221_v61 = vpop.xlane.xlu1 %1220 }
 0x3bb   : > { %1006 = vadd.xlane.f32.xlu1 %v1005_v58  ;;  %v1222_v62 = vsub.f32 %v1213_v41, %v1221_v61 }
 0x3bd   : > { %v1223_v63 = vmul.f32 1.442695, %v1222_v62 }
 0x3bf   : > { %2145 = vpow2.f32 %v1223_v63 }
 0x3c1   : > { %v2144_v59 = vpop.eup %2143 }
 0x3c2   : > { %v1115_v60 = vsel %vm840_vm3, %v2144_v59, 0.0 }
 0x3c3   : > { %1116 = vadd.xlane.f32.xlu0 %v1115_v60 }
 0x3c9   : > { %v2146_v0 = vpop.eup %2145 }
 0x3ca   : > { %v1225_v1 = vsel %vm840_vm3, %v2146_v0, 0.0 }
 0x3cc   : > { %1011 = vrot.lane.b32.xlu1 %v2941_v12, %s2457_s20 }
 0x3d9   : > { %899 = vrot.lane.b32.xlu0 %v2941_v12, %s2458_s17 }
 0x3dd   : > { %1231 = vrot.lane.b32.xlu0 %v2941_v12, %s2459_s22 }
 0x3f0   : > { %1226 = vadd.xlane.f32.xlu1 %v1225_v1 }
 0x401   : > { %1121 = vrot.lane.b32.xlu1 %v2941_v12, %s2460_s14 }
 0x440   : > { %v895_v3 = vpop.xlane.xlu0 %894 }
 0x441   : > { %2147 = vrcp.f32 %v895_v3  ;;  %v2133_v3 = vld [vmem:[%s2897_s19] sm:$0xff]  }
 0x448   : > { %v1007_v5 = vpop.xlane.xlu1 %1006 }
 0x449   : > { %2149 = vrcp.f32 %v1007_v5  ;;  %v2134_v5 = vld [vmem:[%s2897_s19 + $0x8] sm:$0xff]  }
 0x44b   : > { %v2148_v6 = vpop.eup %2147 }
 0x44c   : > { %v897_v8 = vmul.f32 %v2148_v6, %v2140_v52  ;;  %v1012_v11 = vpop.permute.xlu1 %1011 }
 0x44d   : > { %v1017_v15 = vsel %vm904_vm4, %v1012_v11, 0  ;;  %v1855_v11 = vld [vmem:[%s3220_s8] ss:$0 sm:$0xff] }
 0x44e   : > { %v898_v13 = vpack.c.bf16 %v897_v8, %v897_v8 }
 0x450   : > { %v1117_v7 = vpop.xlane.xlu0 %1116 }
 0x451   : > { %2151 = vrcp.f32 %v1117_v7 }
 0x453   : > { %v2150_v14 = vpop.eup %2149 }
 0x454   : > { %v900_v9 = vpop.permute.xlu0 %899  ;;  %v1009_v12 = vmul.f32 %v2150_v14, %v2142_v57 }
 0x455   : > { %v906_v10 = vsel %vm904_vm4, %v900_v9, 0  ;;  %v1854_v9 = vld [vmem:[%s3219_s5] ss:$0 sm:$0xff] }
 0x456   : > { %1922 = vmatpush3.bf16.msra.mxu0 %v906_v10  ;;  %v1010_v16 = vpack.c.bf16 %v1009_v12, %v1009_v12  ;;  %v2135_v12 = vld [vmem:[%s2903_s25] sm:$0xff]  }
 0x457   : > { %1933 = vmatprep.subr.bf16.mxu0 %v2448_v2 }
 0x458   : > { %v1232_v22 = vpop.permute.xlu0 %1231 }
 0x459   : > { %1924 = vmatmul.mubr.msk.bf16.vlgmr.msra.gmra.mrb[4].mxu0 %vm840_vm3, %v898_v13  ;;  %v1237_v24 = vsel %vm904_vm4, %v1232_v22, 0 }
 0x45a   : > { %1934 = vmatpush3.bf16.msra.mxu0 %v1017_v15  ;;  %1935 = vmatprep.mubr.msk.bf16.mxu0 %vm2449_vm1, %v2448_v2 }
 0x45b   : > { %1945 = vmatprep.subr.bf16.mxu0 %v2448_v2  ;;  %v2152_v17 = vpop.eup %2151 }
 0x45c   : > { %v1119_v19 = vmul.f32 %v2152_v17, %v2144_v59  ;;  %v2137_v17 = vld [vmem:[%s2903_s25 + $0x10] sm:$0xff]  }
 0x45e   : > { %v1120_v23 = vpack.c.bf16 %v1119_v19, %v1119_v19  ;;  %v1856_v19 = vld [vmem:[%s611_s0] ss:$0 sm:$0xff] }
 0x461   : > { %1936 = vmatmul.mubr.msk.bf16.vlgmr.msra.gmra.mrb[8].mxu0 %vm840_vm3, %v1010_v16  ;;  %v2136_v16 = vld [vmem:[%s2903_s25 + $0x8] sm:$0xff]  }
 0x462   : > { %1947 = vmatprep.mubr.msk.bf16.mxu0 %vm2449_vm1, %v2448_v2 }
 0x47d   : > { %v1227_v18 = vpop.xlane.xlu1 %1226 }
 0x47e   : > { %2153 = vrcp.f32 %v1227_v18  ;;  %v2138_v18 = vld [vmem:[%s2903_s25 + $0x18] sm:$0xff]  }
 0x481   : > { %v1122_v20 = vpop.permute.xlu1 %1121 }
 0x482   : > { %v1127_v21 = vsel %vm904_vm4, %v1122_v20, 0 }
 0x483   : > { %1946 = vmatpush3.bf16.msra.mxu0 %v1127_v21 }
 0x484   : > { %1957 = vmatprep.subr.bf16.mxu0 %v2448_v2 }
 0x486   : > { %1948 = vmatmul.mubr.msk.bf16.vlgmr.msra.gmra.mrb[12].mxu0 %vm840_vm3, %v1120_v23 }
 0x487   : > { %1958 = vmatpush3.bf16.msra.mxu0 %v1237_v24  ;;  %1959 = vmatprep.mubr.msk.bf16.mxu0 %vm2449_vm1, %v2448_v2 }
 0x488   : > { %v2154_v25 = vpop.eup %2153  ;;  %1971 = vmatprep.subr.bf16.mxu0 %v2448_v2 }
 0x489   : > { %v1229_v26 = vmul.f32 %v2154_v25, %v2146_v0 }
 0x48b   : > { %v1230_v27 = vpack.c.bf16 %v1229_v26, %v1229_v26 }
 0x48e   : > { %1960 = vmatmul.mubr.msk.bf16.vlgmr.msra.gmra.mrb[16].mxu0 %vm840_vm3, %v1230_v27 }
 0x48f   : > { %1975 = vmatprep.mubr.msk.bf16.mxu0 %vm2449_vm1, %v2448_v2  ;;  %1972 = vmatpush3.bf16.msra.mxu0 %v2133_v3 }
 0x490   : > { %1973 = vmatprep.subr.bf16.mxu0 %v2448_v2 }
 0x493   : > { %1974 = vmatpush3.bf16.msra.mxu0 %v2134_v5 }
 0x52c   : > { %v942_v28 = vpop.f32.mrb[4].mxu0 }
 0x52d   : > { %v1925_v29 = vpop.f32.mrb[5].mxu0 }
 0x52e   : > { %v945_v30 = vpop.f32.mrb[6].mxu0 }
 0x52f   : > { %v1926_v31 = vpop.f32.mrb[7].mxu0 }
 0x534   : > { %v1053_v32 = vpop.f32.mrb[8].mxu0 }
 0x535   : > { %1280 = vrot.lane.b32.xlu1 %v1053_v32, %s2461_s11  ;;  %v1937_v33 = vpop.f32.mrb[9].mxu0 }
 0x536   : > { %v1056_v34 = vpop.f32.mrb[10].mxu0 }
 0x537   : > { %v1938_v35 = vpop.f32.mrb[11].mxu0 }
 0x559   : > { %v1163_v38 = vpop.f32.mrb[12].mxu0 }
 0x55a   : > { %1284 = vrot.lane.b32.xlu0 %v1163_v38, %s2462_s3  ;;  %v1949_v39 = vpop.f32.mrb[13].mxu0 }
 0x55b   : > { %v1166_v40 = vpop.f32.mrb[14].mxu0 }
 0x55c   : > { %v1950_v41 = vpop.f32.mrb[15].mxu0 }
 0x561   : > { %v1273_v42 = vpop.f32.mrb[16].mxu0 }
 0x562   : > { %1288 = vrot.lane.b32.xlu1 %v1273_v42, %s2463_s21  ;;  %v1961_v43 = vpop.f32.mrb[17].mxu0 }
 0x563   : > { %v1276_v44 = vpop.f32.mrb[18].mxu0 }
 0x564   : > { %v1962_v45 = vpop.f32.mrb[19].mxu0 }
 0x5a7   : > { %v1281_v46 = vpop.permute.xlu1 %1280 }
 0x5a8   : > { %v1291_v48 = vsel %vm840_vm3, %v942_v28, %v1281_v46 }
 0x5cc   : > { %v1285_v47 = vpop.permute.xlu0 %1284 }
 0x5cd   : > { %v1293_v49 = vsel %vm1292_vm5, %v1291_v48, %v1285_v47  ;;  %v1866_v47 = vld [vmem:[%s730_s15] ss:$0 sm:$0xff] }
 0x5d4   : > { %v1289_v50 = vpop.permute.xlu1 %1288 }
 0x5d5   : > { %v1295_v51 = vsel %vm1294_vm6, %v1293_v49, %v1289_v50  ;;  %v1867_v49 = vld [vmem:[%s733_s2] ss:$0 sm:$0xff] }
 0x5d6   : > { %v1296_v52 = vpack.c.bf16 %v1295_v51, %v1295_v51 }
 0x5d8   : > { %1968 = vmatmul.mubr.msk.bf16.vlgmr.msra.gmra.mrb[16].mxu1 %vm790_vm2, %v1296_v52 }
 0x5d9   : > { %1987 = vmatprep.mubr.msk.bf16.mxu1 %vm2449_vm1, %v2448_v2  ;;  %1980 = vmatpush3.bf16.msra.mxu1 %v2135_v12 }
 0x5da   : > { %1981 = vmatprep.subr.bf16.mxu1 %v2448_v2 }
 0x5dd   : > { %1982 = vmatpush3.bf16.msra.mxu1 %v2136_v16 }
 0x5de   : > { %1983 = vmatprep.subr.bf16.mxu1 %v2448_v2 }
 0x5e1   : > { %1984 = vmatpush3.bf16.msra.mxu1 %v2137_v17 }
 0x5e2   : > { %1985 = vmatprep.subr.bf16.mxu1 %v2448_v2  ;;  %v1860_v2 = vld [vmem:[%s727_s24] ss:$0 sm:$0xff] }
 0x5e5   : > { %1986 = vmatpush3.bf16.msra.mxu1 %v2138_v18 }
 0x6ab   : > { %v1352_v54 = vpop.f32.mrb[16].mxu1 }
 0x6ac   : > { %v1353_v55 = vadd.f32 %v1850_v53, %v1352_v54  ;;  %v1969_v56 = vpop.f32.mrb[17].mxu1 }
 0x6ad   : > { %v1355_v57 = vpop.f32.mrb[18].mxu1 }
 0x6ae   : > { %v1970_v58 = vpop.f32.mrb[19].mxu1  ;;  %v1358_v59 = vadd.f32 %v1353_v55, %v2925_v4 }
 0x6b0   : > { %v1359_v60 = vsel %vm790_vm2, %v1358_v59, 0.0 }
 0x6b1   : > { %1360 = vadd.xlane.f32.xlu0 %v1359_v60 }
 0x73e   : > { %v1361_v61 = vpop.xlane.xlu0 %1360 }
 0x73f   : > { %v1363_v62 = vmul.f32 0.03125, %v1361_v61 }
 0x741   : > { %v1364_v63 = vsub.f32 %v1358_v59, %v1363_v62 }
 0x743   : > { %v1365_v0 = vmul.f32 %v1364_v63, %v1364_v63 }
 0x745   : > { %v1366_v1 = vsel %vm790_vm2, %v1365_v0, 0.0 }
 0x746   : > { %1367 = vadd.xlane.f32.xlu1 %v1366_v1 }
 0x7d3   : > { %v1368_v4 = vpop.xlane.xlu1 %1367 }
 0x7d4   : > { %v1369_v6 = vmul.f32 0.03125, %v1368_v4 }
 0x7d6   : > { %v1370_v7 = vadd.f32 1e-05, %v1369_v6 }
 0x7d8   : > { %2155 = vrsqrt.f32 %v1370_v7 }
 0x7e2   : > { %v2156_v8 = vpop.eup %2155 }
 0x7e3   : > { %v1372_v10 = vmul.f32 %v2156_v8, %v1364_v63 }
 0x7e5   : > { %v1379_v13 = vmul.f32 %v1854_v9, %v1372_v10 }
 0x7e7   : > { %v1386_v14 = vadd.f32 %v1855_v11, %v1379_v13 }
 0x7e9   : > { %v1387_v15 = vpack.c.bf16 %v1386_v14, %v1386_v14 }
 0x7eb   : > { %1976 = vmatmul.mubr.msk.bf16.vlgmr.msra.gmra.mrb[20].mxu0 %vm790_vm2, %v1387_v15 }
 0x8be   : > { %v1443_v20 = vpop.f32.mrb[20].mxu0 }
 0x8bf   : > { %v1444_v21 = vadd.f32 %v1856_v19, %v1443_v20  ;;  %v1977_v22 = vpop.f32.mrb[21].mxu0 }
 0x8c0   : > { %v1446_v23 = vpop.f32.mrb[22].mxu0 }
 0x8c1   : > { %v1450_v24 = vmul.f32 0.70710677, %v1444_v21  ;;  %v1978_v25 = vpop.f32.mrb[23].mxu0  ;;  %v1449_v27 = vmul.f32 0.5, %v1444_v21 }
 0x8c3   : > { %2157 = verf.f32 %v1450_v24 }
 0x8cd   : > { %v2158_v26 = vpop.eup %2157 }
 0x8ce   : > { %v1452_v28 = vadd.f32 1.0, %v2158_v26 }
 0x8d0   : > { %v1453_v29 = vmul.f32 %v1452_v28, %v1449_v27 }
 0x8d2   : > { %v1454_v30 = vpack.c.bf16 %v1453_v29, %v1453_v29 }
 0x8d4   : > { %1988 = vmatmul.mubr.msk.bf16.vlgmr.msra.gmra.mrb[20].mxu1 %vm1485_vm7, %v1454_v30 }
 0x9a7   : > { %v1523_v31 = vpop.f32.mrb[20].mxu1 }
 0x9a8   : > { %v1524_v32 = vadd.f32 %v1860_v2, %v1523_v31  ;;  %v1989_v33 = vpop.f32.mrb[21].mxu1 }
 0x9a9   : > { %v1526_v34 = vpop.f32.mrb[22].mxu1 }
 0x9aa   : > { %v1990_v35 = vpop.f32.mrb[23].mxu1  ;;  %v1529_v36 = vadd.f32 %v1524_v32, %v1386_v14 }
 0x9ac   : > { %v1530_v37 = vsel %vm790_vm2, %v1529_v36, 0.0 }
 0x9ad   : > { %1531 = vadd.xlane.f32.xlu0 %v1530_v37 }
 0xa3a   : > { %v1532_v38 = vpop.xlane.xlu0 %1531 }
 0xa3b   : > { %v1533_v39 = vmul.f32 0.03125, %v1532_v38 }
 0xa3d   : > { %v1534_v40 = vsub.f32 %v1529_v36, %v1533_v39 }
 0xa3f   : > { %v1535_v41 = vmul.f32 %v1534_v40, %v1534_v40 }
 0xa41   : > { %v1536_v42 = vsel %vm790_vm2, %v1535_v41, 0.0 }
 0xa42   : > { %1537 = vadd.xlane.f32.xlu0 %v1536_v42 }
 0xacf   : > { %v1538_v43 = vpop.xlane.xlu0 %1537 }
 0xad0   : > { %v1539_v44 = vmul.f32 0.03125, %v1538_v43 }
 0xad2   : > { %v1540_v45 = vadd.f32 1e-05, %v1539_v44 }
 0xad4   : > { %2159 = vrsqrt.f32 %v1540_v45 }
 0xade   : > { %v2160_v46 = vpop.eup %2159 }
 0xadf   : > { %v1542_v48 = vmul.f32 %v2160_v46, %v1534_v40  ;;  %1561 = sbr.rel (%p1868_p7) target bundleno = 2790 (0xae6), region = 100 }
 0xae1   : > { %v1549_v50 = vmul.f32 %v1866_v47, %v1542_v48 }
 0xae3   : > { %v1556_v51 = vadd.f32 %v1867_v49, %v1549_v50 }
 0xae5   : > { %1557 = vst.msk [vmem:[#allocation2] sm:$0xff] %vm790_vm2, %v1556_v51  ;;  %1562 = vst.msk [vmem:[%s2918_s12] sm:$0xff] (!%p1868_p7), %vm790_vm2, %v1556_v51 }
 0xae6 PF: > { %s3225_s27 = sld [smem:[#allocation23_spill]]  ;;  %s3226_s7 = sld [smem:[#allocation45_spill]] }
 0xae7   : > { %s1577_s6 = sshll.u32 %s2918_s12, 4  ;;  %s1564_s20 = scalar_lea.sflag [#allocation5], %s2854_s16  ;;  %s1578_s6 = int_to_ptr.vmem [resolvable:$true] %s1577_s6 }
 0xae8   : > { %s2311_s17 = scalar_lea.vmem %s1578_s6, 128  ;;  %p3227_p13 = scmp.ne.s32.totalorder %s3192_s23, 0 }
 0xae9   : > { %p2312_p12 = scmp.ne.s32.totalorder %s1578_s6, %s2311_s17  ;;  %s2464_s22 = smov [#allocation12]  }
 0xaea   : > { %s2315_s14 = sshll.u32 %s2464_s22, 4  ;;  %s2316_s14 = int_to_ptr.vmem [resolvable:$false] %s2315_s14 }
 0xaeb   : > { %p2313_p0 = pnand %p2312_p12, %p3227_p13  ;;  %s2317_s11 = scalar_lea.vmem %s2316_s14, 256 }
 0xaec   : > { %s1870_s15 = sshll.u32 %s3225_s27, 7  ;;  %p2318_p1 = scmp.lt.s32.totalorder %s1578_s6, %s2316_s14 }
 0xaed   : > { %s3054_s2 = scalar_lea.hbm %s3226_s7, %s1870_s15  ;;  %p2314_p4 = pneg %p2313_p0 }
 0xaee   : > { %p2319_p3 = scmp.lt.s32.totalorder %s2317_s11, %s2311_s17 }
 0xaf0   : > { %p2320_p5 = por %p2319_p3, %p2318_p1 }
 0xaf2   : > { %p2321_p10 = pnand %p2320_p5, %p2314_p4 }
 0xaf4   : > { %2324 = shalt.err (!%p2321_p10)
}
 0xaf5   : > { %s2325_s16 = scalar_lea.hbm %s3054_s2, 128  ;;  %s2329_s21 = scalar_lea.hbm %s3226_s7, 256 }
 0xaf6   : > { %p2326_p8 = scmp.ne.s32.totalorder %s3054_s2, %s2325_s16  ;;  %p2330_p2 = scmp.lt.u32.totalorder %s3054_s2, %s3226_s7 }
 0xaf7   : > { %p2331_p6 = scmp.lt.u32.totalorder %s2329_s21, %s2325_s16  ;;  %p2333_p12 = scmp.lt.u32.totalorder %s2325_s16, %s3054_s2 }
 0xaf8   : > { %p2327_p11 = pnand %p2326_p8, %p3227_p13 }
 0xaf9   : > { %p2332_p7 = por %p2331_p6, %p2330_p2 }
 0xafa   : > { %p2328_p9 = pneg %p2327_p11 }
 0xafb   : > { %p2334_p0 = por %p2333_p12, %p2332_p7 }
 0xafd   : > { %p2335_p4 = pnand %p2334_p0, %p2328_p9 }
 0xaff   : > { %2338 = shalt.err (!%p2335_p4)
}
 0xb00   : > { %2001 = dma.vmem_to_hbm [thread:$0]  (%p3227_p13), %s1578_s6, 128, %s3054_s2, %s1564_s20  }
 0xb01 PF: > { %s3228_s8 = sld [smem:[#allocation19_spill]]  ;;  %s3229_s19 = sld [smem:[#allocation31_spill]] }
 0xb02   : > { %p2024_p1 = scmp.ge.s32.totalorder %s2441_s18, 2 }
 0xb07   : > { %s1589_s25 = sand.u32 1, %s3228_s8   ;;  %p3230_p3 = scmp.ne.s32.totalorder %s3229_s19, 0 }
 0xb08   : > { %s1590_s26 = scalar_lea.sflag [#allocation5], %s1589_s25 }
 0xb09   : > { %p2020_p5 = pnand %p2024_p1, %p3230_p3 }
 0xb0b   : > { %2396 = dma.done.wait (!%p2020_p5), %s1590_s26, 128  }
 0xb0c   : > { %2398 = vsyncadd (!%p2020_p5), %s1590_s26, 4294967168  ;;  %s35_s18 = sadd.s32 1, %s2441_s18   ;;  %s3231_s25 = sld [smem:[#allocation17_spill]] }
 0xb0d   : > { %p32_p10 = scmp.ge.s32.totalorder %s35_s18, 6   ;;  %s3232_s26 = sld [smem:[#allocation18_spill]] }
 0xb0e   : > { %s3233_s27 = sld [smem:[#allocation27_spill]]  ;;  %s3234_s28 = sld [smem:[#allocation20_spill]] }
 0xb0f   : > { %s3235_s29 = sld [smem:[#allocation21_spill]]  ;;  %s3236_s30 = sld [smem:[#allocation30_spill]] }
 0xb10   : > { %s3237_s14 = sld [smem:[#allocation24_spill]]  ;;  %s3238_s15 = sld [smem:[#allocation25_spill]] }
 0xb11   : > { %s3239_s16 = sld [smem:[#allocation26_spill]]  ;;  %s3240_s17 = sld [smem:[#allocation28_spill]] }
 0xb12   :  { %34 = sbr.rel (!%p32_p10) target bundleno = 28 (0x1c), region = 197 }
 0xb19   :  { %1595 = vsyncpa [#allocation4], 1 }
 0xb1a   :  { %1597 = vsyncpa [#allocation4 + $0x1], 1 }
 0xb1b   :  { %1598 = vsyncpa [#allocation7], 1 }
 0xb1c   :  { %1600 = vsyncpa [#allocation7 + $0x1], 1 }
 0xb1d   :  { %1601 = vsyncpa [#allocation10], 1 }
 0xb1e   :  { %1603 = vsyncpa [#allocation10 + $0x1], 1 }
 0xb1f   :  { %1604 = vsyncpa [#allocation5], 1 }
 0xb20   :  { %1606 = vsyncpa [#allocation5 + $0x1], 1 }

</bundles_post_ra>
